<compile_context>
chip_gen: v5e
topology: v5e:2x2
jax: 0.10.0
libtpu: 0.0.40
codegen_flags: <defaults>
</compile_context>

<pallas_src>
import functools

import jax
import jax.numpy as jnp
import numpy as np
from jax.experimental import pallas as pl
from jax.experimental.pallas import tpu as pltpu


def _round_up(n, m):
    return ((n + m - 1) // m) * m


def top_ensemble_kernel(x_ref, w_ref, b_ref, out_ref, *,
                        num_experts, e_pad, h_pad):
    """Fused scorer + top-1-gated experts; batch on the lane axis of y/out.

    x_ref  : (TB, D)                 x tile in its native layout (no transpose)
    w_ref  : (E_pad + E*H_pad, D)    fused, sublane-aligned [scorer; experts]
    b_ref  : (E_pad + E*H_pad, 1)    fused biases; scorer pad rows hold -1e30
    out_ref: (H_pad, TB)             gated top-1 expert output (lane-dense)
    """
    E = num_experts

    # --- single fused MXU call: scorer logits + every expert output.
    # Contract on D of BOTH operands (== W @ x^T), so x needs no wrapper-side
    # transpose and the result keeps the batch on the 128-wide lane axis.
    y = jax.lax.dot_general(w_ref[...], x_ref[...],
                            (((1,), (1,)), ((), ())),
                            preferred_element_type=jnp.float32)          # (R, TB)
    y = y + b_ref[...]                                                   # lane bcast

    # --- scorer block: top-1 gate without materializing the softmax.
    # argmax(softmax(z)) == argmax(z); softmax(z)[argmax(z)] == 1/sum(exp(z-max)).
    # Pad rows already carry a -1e30 bias (baked at build time) -> no mask here.
    logits = y[:e_pad, :]                                                # (E_pad, TB)
    m = jnp.max(logits, axis=0, keepdims=True)                           # (1, TB)
    denom = jnp.sum(jnp.exp(logits - m), axis=0, keepdims=True)          # (1, TB)
    gate = pl.reciprocal(denom)               # exact; approx=True breaks 1e-5 tol

    # argmax with first-occurrence tie-breaking (matches torch.argmax).
    row_ids = jax.lax.broadcasted_iota(jnp.int32, logits.shape, 0)
    idx = jnp.min(jnp.where(logits == m, row_ids, e_pad),
                  axis=0, keepdims=True)                                 # (1, TB) i32

    # --- top-1 select over the fused expert slab (8-aligned H_pad segments).
    # Gate folded into the tiny (1, TB) select masks; first term seeds `out`.
    sel = gate * (idx == 0).astype(jnp.float32)
    out = sel * y[e_pad:e_pad + h_pad, :]
    for ei in range(1, E):                                               # E static
        sel = gate * (idx == ei).astype(jnp.float32)
        out = out + sel * y[e_pad + ei * h_pad:e_pad + (ei + 1) * h_pad, :]
    out_ref[...] = out


def build_fused_params(ws, bs, we, be):
    """Pack scorer + expert params into a sublane-aligned weight slab + bias.

    ws: (E, D) torch (out,in) layout; bs: (E,); we: (E, H, D); be: (E, H).
    Scorer pad rows get bias -1e30 so the kernel needs no pad-row mask.
    Done once (parameter-init time in a real model; constant-folds under jit).
    """
    E, D = ws.shape
    _, H, _ = we.shape
    e_pad = _round_up(E, 8)
    h_pad = _round_up(H, 8)
    R = e_pad + E * h_pad
    w = jnp.zeros((R, D), jnp.float32).at[:E].set(ws)
    b = jnp.zeros((R, 1), jnp.float32).at[:E, 0].set(bs)
    if e_pad > E:
        b = b.at[E:e_pad, 0].set(-1e30)     # bake scorer pad-row mask into bias
    for ei in range(E):
        off = e_pad + ei * h_pad
        w = w.at[off:off + H].set(we[ei])
        b = b.at[off:off + H, 0].set(be[ei])
    return w, b, e_pad, h_pad


def _num_tensorcores():
    """v7x exposes 2 TensorCores per chip; v5e/v6e have 1.

    Grid steps run serially on one TC, so the batch is only split when a
    second core exists to take the other block.
    """
    try:
        kind = jax.devices()[0].device_kind.lower()
    except Exception:
        return 1
    return 2 if "v7" in kind else 1


@functools.partial(
    jax.jit,
    static_argnames=("num_experts", "hidden", "e_pad", "h_pad",
                     "num_blocks", "core_parallel"))
def _forward(x, w_fused, b_fused, *, num_experts, hidden, e_pad, h_pad,
             num_blocks, core_parallel):
    B, D = x.shape
    R = w_fused.shape[0]
    tb = B // num_blocks

    semantics = (pltpu.CORE_PARALLEL,) if core_parallel else ("arbitrary",)
    out_t = pl.pallas_call(
        functools.partial(top_ensemble_kernel, num_experts=num_experts,
                          e_pad=e_pad, h_pad=h_pad),
        out_shape=jax.ShapeDtypeStruct((h_pad, B), jnp.float32),
        grid=(num_blocks,),
        in_specs=[
            pl.BlockSpec((tb, D), lambda i: (i, 0)),     # x tile, native layout
            pl.BlockSpec((R, D), lambda i: (0, 0)),      # fused weights (resident)
            pl.BlockSpec((R, 1), lambda i: (0, 0)),      # fused biases
        ],
        out_specs=pl.BlockSpec((h_pad, tb), lambda i: (0, i)),  # lane-dense store
        compiler_params=pltpu.CompilerParams(dimension_semantics=semantics),
    )(x, w_fused, b_fused)

    # Lane-dense (H_pad, B) slab out of the kernel; the slice + transpose back
    # to the PyTorch (B, H) layout stays in the SAME jit so it fuses with any
    # downstream consumer instead of being a standalone pass over the output.
    return out_t[:hidden, :].T


def top_ensemble(x, w_fused, b_fused, *, num_experts, hidden, e_pad, h_pad):
    """x: (B, D) f32.  Returns (B, H) f32, matching TopEnsemble.forward."""
    B = x.shape[0]
    n_cores = _num_tensorcores()
    kwargs = dict(num_experts=num_experts, hidden=hidden,
                  e_pad=e_pad, h_pad=h_pad)
    if n_cores > 1 and B % (128 * n_cores) == 0:
        # One large block per TensorCore (v7x). Fall back to the universally
        # supported single-block path if core-parallel lowering declines.
        try:
            return jax.block_until_ready(
                _forward(x, w_fused, b_fused, num_blocks=n_cores,
                         core_parallel=True, **kwargs))
        except Exception:
            pass
    return _forward(x, w_fused, b_fused, num_blocks=1,
                    core_parallel=False, **kwargs)


def reference(x, ws, bs, we, be):
    """Pure-JAX reference mirroring the PyTorch forward exactly."""
    scores = jax.nn.softmax(x @ ws.T + bs, axis=-1)                    # (B, E)
    idx = jnp.argmax(scores, axis=-1)                                  # (B,)
    y_all = jnp.einsum('bd,ehd->beh', x, we) + be[None]                # (B, E, H)
    y_sel = jnp.take_along_axis(y_all, idx[:, None, None], axis=1)[:, 0]
    gate = jnp.take_along_axis(scores, idx[:, None], axis=1)           # (B, 1)
    return gate * y_sel


if __name__ == "__main__":
    # Shapes consistent with the module spec: x = randn(1024, 12), input_dim=12,
    # experts = Linear(12, 12); num_experts = 4.
    B, D, E = 1024, 12, 4
    H = D

    key = jax.random.PRNGKey(0)
    kx, kws, kbs, kwe, kbe = jax.random.split(key, 5)
    x = jax.random.normal(kx, (B, D), dtype=jnp.float32)
    ws = 0.3 * jax.random.normal(kws, (E, D), dtype=jnp.float32)   # torch (out,in)
    bs = 0.1 * jax.random.normal(kbs, (E,), dtype=jnp.float32)
    we = 0.3 * jax.random.normal(kwe, (E, H, D), dtype=jnp.float32)
    be = 0.1 * jax.random.normal(kbe, (E, H), dtype=jnp.float32)

    w_fused, b_fused, e_pad, h_pad = build_fused_params(ws, bs, we, be)
    out = jax.block_until_ready(
        top_ensemble(x, w_fused, b_fused, num_experts=E, hidden=H,
                     e_pad=e_pad, h_pad=h_pad))
    ref = jax.block_until_ready(reference(x, ws, bs, we, be))
    np.testing.assert_allclose(np.asarray(out), np.asarray(ref),
                               rtol=1e-5, atol=1e-5)
    print("KERNEL_OK")
</pallas_src>

<mosaic_0001>
module attributes {stable_mosaic.version = 11 : i64} {
  func.func @top_ensemble_kernel(%arg0: i32, %arg1: memref<1024x12xf32, #tpu.memory_space<vmem>>, %arg2: memref<72x12xf32, #tpu.memory_space<vmem>>, %arg3: memref<72x1xf32, #tpu.memory_space<vmem>>, %arg4: memref<16x1024xf32, #tpu.memory_space<vmem>>) attributes {dimension_semantics = [#tpu.dimension_semantics<arbitrary>], iteration_bounds = array<i64: 1>, scalar_prefetch = 0 : i64, scratch_operands = 0 : i64, tpu.core_type = #tpu.core_type<tc>, window_params = [{transform_indices = @transform_0, window_bounds = array<i64: 1024, 12>}, {pipeline_mode = #tpu.pipeline_mode<synchronous>, transform_indices = @transform_1, window_bounds = array<i64: 72, 12>}, {pipeline_mode = #tpu.pipeline_mode<synchronous>, transform_indices = @transform_2, window_bounds = array<i64: 72, 1>}, {transform_indices = @transform_3, window_bounds = array<i64: 16, 1024>}]} {
    %c0 = arith.constant 0 : index
    %c0_0 = arith.constant 0 : index
    %0 = vector.load %arg2[%c0, %c0_0] : memref<72x12xf32, #tpu.memory_space<vmem>>, vector<72x12xf32>
    %c0_1 = arith.constant 0 : index
    %c0_2 = arith.constant 0 : index
    %1 = vector.load %arg1[%c0_1, %c0_2] : memref<1024x12xf32, #tpu.memory_space<vmem>>, vector<1024x12xf32>
    %cst = arith.constant dense<0.000000e+00> : vector<72x1024xf32>
    %2 = tpu.matmul %0, %1, %cst {dimension_numbers = #tpu.dot_dimension_numbers<[1], [1], [0], [0], [0, 0, 1, 0], [], []>} : vector<72x12xf32>, vector<1024x12xf32>, vector<72x1024xf32> -> vector<72x1024xf32>
    %c0_3 = arith.constant 0 : index
    %c0_4 = arith.constant 0 : index
    %3 = vector.load %arg3[%c0_3, %c0_4] : memref<72x1xf32, #tpu.memory_space<vmem>>, vector<72x1xf32>
    %4 = vector.broadcast %3 : vector<72x1xf32> to vector<72x1024xf32>
    %5 = arith.addf %2, %4 : vector<72x1024xf32>
    %6 = vector.extract_strided_slice %5 {offsets = [0, 0], sizes = [8, 1024], strides = [1, 1]} : vector<72x1024xf32> to vector<8x1024xf32>
    %cst_5 = arith.constant dense<0xFF800000> : vector<1024xf32>
    %7 = vector.multi_reduction <maximumf>, %6, %cst_5 [0] : vector<8x1024xf32> to vector<1024xf32>
    %8 = vector.shape_cast %7 : vector<1024xf32> to vector<1x1024xf32>
    %9 = vector.broadcast %8 : vector<1x1024xf32> to vector<8x1024xf32>
    %10 = arith.subf %6, %9 : vector<8x1024xf32>
    %11 = math.exp %10 : vector<8x1024xf32>
    %cst_6 = arith.constant dense<0.000000e+00> : vector<1024xf32>
    %12 = vector.multi_reduction <add>, %11, %cst_6 [0] : vector<8x1024xf32> to vector<1024xf32>
    %13 = vector.shape_cast %12 : vector<1024xf32> to vector<1x1024xf32>
    %14 = tpu.reciprocal %13 : vector<1x1024xf32> -> vector<1x1024xf32>
    %15 = tpu.iota {dimensions = array<i32: 0>} : vector<8x1024xi32>
    %16 = vector.broadcast %8 : vector<1x1024xf32> to vector<8x1024xf32>
    %17 = arith.cmpf oeq, %6, %16 : vector<8x1024xf32>
    %c8_i32 = arith.constant 8 : i32
    %18 = vector.broadcast %c8_i32 : i32 to vector<8x1024xi32>
    %19 = arith.select %17, %15, %18 : vector<8x1024xi1>, vector<8x1024xi32>
    %cst_7 = arith.constant dense<2147483647> : vector<1024xi32>
    %20 = vector.multi_reduction <minsi>, %19, %cst_7 [0] : vector<8x1024xi32> to vector<1024xi32>
    %21 = vector.shape_cast %20 : vector<1024xi32> to vector<1x1024xi32>
    %c0_i32 = arith.constant 0 : i32
    %22 = vector.broadcast %c0_i32 : i32 to vector<1x1024xi32>
    %23 = arith.cmpi eq, %21, %22 : vector<1x1024xi32>
    %24 = arith.extui %23 : vector<1x1024xi1> to vector<1x1024xi32>
    %25 = arith.sitofp %24 : vector<1x1024xi32> to vector<1x1024xf32>
    %26 = arith.mulf %14, %25 : vector<1x1024xf32>
    %27 = vector.extract_strided_slice %5 {offsets = [8, 0], sizes = [16, 1024], strides = [1, 1]} : vector<72x1024xf32> to vector<16x1024xf32>
    %28 = vector.broadcast %26 : vector<1x1024xf32> to vector<16x1024xf32>
    %29 = arith.mulf %28, %27 : vector<16x1024xf32>
    %c1_i32 = arith.constant 1 : i32
    %30 = vector.broadcast %c1_i32 : i32 to vector<1x1024xi32>
    %31 = arith.cmpi eq, %21, %30 : vector<1x1024xi32>
    %32 = arith.extui %31 : vector<1x1024xi1> to vector<1x1024xi32>
    %33 = arith.sitofp %32 : vector<1x1024xi32> to vector<1x1024xf32>
    %34 = arith.mulf %14, %33 : vector<1x1024xf32>
    %35 = vector.extract_strided_slice %5 {offsets = [24, 0], sizes = [16, 1024], strides = [1, 1]} : vector<72x1024xf32> to vector<16x1024xf32>
    %36 = vector.broadcast %34 : vector<1x1024xf32> to vector<16x1024xf32>
    %37 = arith.mulf %36, %35 : vector<16x1024xf32>
    %38 = arith.addf %29, %37 : vector<16x1024xf32>
    %c2_i32 = arith.constant 2 : i32
    %39 = vector.broadcast %c2_i32 : i32 to vector<1x1024xi32>
    %40 = arith.cmpi eq, %21, %39 : vector<1x1024xi32>
    %41 = arith.extui %40 : vector<1x1024xi1> to vector<1x1024xi32>
    %42 = arith.sitofp %41 : vector<1x1024xi32> to vector<1x1024xf32>
    %43 = arith.mulf %14, %42 : vector<1x1024xf32>
    %44 = vector.extract_strided_slice %5 {offsets = [40, 0], sizes = [16, 1024], strides = [1, 1]} : vector<72x1024xf32> to vector<16x1024xf32>
    %45 = vector.broadcast %43 : vector<1x1024xf32> to vector<16x1024xf32>
    %46 = arith.mulf %45, %44 : vector<16x1024xf32>
    %47 = arith.addf %38, %46 : vector<16x1024xf32>
    %c3_i32 = arith.constant 3 : i32
    %48 = vector.broadcast %c3_i32 : i32 to vector<1x1024xi32>
    %49 = arith.cmpi eq, %21, %48 : vector<1x1024xi32>
    %50 = arith.extui %49 : vector<1x1024xi1> to vector<1x1024xi32>
    %51 = arith.sitofp %50 : vector<1x1024xi32> to vector<1x1024xf32>
    %52 = arith.mulf %14, %51 : vector<1x1024xf32>
    %53 = vector.extract_strided_slice %5 {offsets = [56, 0], sizes = [16, 1024], strides = [1, 1]} : vector<72x1024xf32> to vector<16x1024xf32>
    %54 = vector.broadcast %52 : vector<1x1024xf32> to vector<16x1024xf32>
    %55 = arith.mulf %54, %53 : vector<16x1024xf32>
    %56 = arith.addf %47, %55 : vector<16x1024xf32>
    %c0_8 = arith.constant 0 : index
    %c0_9 = arith.constant 0 : index
    %57 = vector.load %arg4[%c0_8, %c0_9] : memref<16x1024xf32, #tpu.memory_space<vmem>>, vector<16x1024xf32>
    tpu.vector_store %arg4[%c0_8, %c0_9], %56 {strides = array<i32>} : memref<16x1024xf32, #tpu.memory_space<vmem>>, vector<16x1024xf32>,
    return
  }
  func.func @transform_0(%arg0: i32) -> (i32, i32) {
    %c0_i32 = arith.constant 0 : i32
    %c0_i32_0 = arith.constant 0 : i32
    return %arg0, %c0_i32 : i32, i32
  }
  func.func @transform_1(%arg0: i32) -> (i32, i32) {
    %c0_i32 = arith.constant 0 : i32
    %c0_i32_0 = arith.constant 0 : i32
    %c0_i32_1 = arith.constant 0 : i32
    return %c0_i32, %c0_i32_0 : i32, i32
  }
  func.func @transform_2(%arg0: i32) -> (i32, i32) {
    %c0_i32 = arith.constant 0 : i32
    %c0_i32_0 = arith.constant 0 : i32
    %c0_i32_1 = arith.constant 0 : i32
    return %c0_i32, %c0_i32_0 : i32, i32
  }
  func.func @transform_3(%arg0: i32) -> (i32, i32) {
    %c0_i32 = arith.constant 0 : i32
    %c0_i32_0 = arith.constant 0 : i32
    return %c0_i32, %arg0 : i32, i32
  }
}

</mosaic_0001>

<bundles_post_ra>
// kernel: _forward.1
= control target key start
LH: loop header
LB: loop body
LE: loop exit
PB: predicated region body
PF: predicated region fallthrough
CT: control target
= control target key end

     0   :  { %vm205_vm0 = vcmask 97280   ;;  %v1820_v49 = vmov 0   ;;  %s3242_s0 = inlined_call_operand.vmem [shape: f32[1024,12], index: 0, kind: input, shape index: {}]   ;;  %s3243_s2 = inlined_call_operand.vmem [shape: f32[72,1], index: 2, kind: input, shape index: {}]   ;;  %s3244_s1 = inlined_call_operand.vmem [shape: f32[72,12], index: 1, kind: input, shape index: {}]   ;;  %s3245_s3 = inlined_call_operand.vmem [shape: f32[16,1024], index: 3, kind: output, shape index: {}]  }
   0x1   :  { %v38_v0 = vld [vmem:[%s3242_s0 + $0x78] sm:$0xff]  ;;  %v37_v4 = vld [vmem:[%s3242_s0 + $0x70] sm:$0xff]  ;;  %v36_v8 = vld [vmem:[%s3242_s0 + $0x68] sm:$0xff]  ;;  %1785 = vset.pattern.permute.xlu0 %v1820_v49  ;;  %1786 = vset.pattern.permute.xlu1 %v1820_v49 }
   0x2   :  { %v54_v1 = vld [vmem:[%s3242_s0 + $0xf8] sm:$0xff]  ;;  %1551 = vmatpush.xpose.msk.msra.mxu0 %vm205_vm0, %v38_v0  ;;  %v53_v5 = vld [vmem:[%s3242_s0 + $0xf0] sm:$0xff]  ;;  %v52_v9 = vld [vmem:[%s3242_s0 + $0xe8] sm:$0xff]  ;;  %1787 = vset.pattern.permute.xlu2 %v1820_v49 }
   0x3   :  { %v70_v2 = vld [vmem:[%s3242_s0 + $0x178] sm:$0xff]  ;;  %1576 = vmatpush.xpose.msk.msra.mxu1 %vm205_vm0, %v54_v1  ;;  %v69_v6 = vld [vmem:[%s3242_s0 + $0x170] sm:$0xff]  ;;  %v68_v10 = vld [vmem:[%s3242_s0 + $0x168] sm:$0xff] }
   0x4   :  { %v86_v3 = vld [vmem:[%s3242_s0 + $0x1f8] sm:$0xff]  ;;  %1601 = vmatpush.xpose.msk.msra.mxu2 %vm205_vm0, %v70_v2  ;;  %v85_v7 = vld [vmem:[%s3242_s0 + $0x1f0] sm:$0xff]  ;;  %v84_v11 = vld [vmem:[%s3242_s0 + $0x1e8] sm:$0xff] }
   0x5   :  { %1626 = vmatpush.xpose.msk.msra.mxu3 %vm205_vm0, %v86_v3  ;;  %v35_v12 = vld [vmem:[%s3242_s0 + $0x60] sm:$0xff]  ;;  %v34_v16 = vld [vmem:[%s3242_s0 + $0x58] sm:$0xff]  ;;  %v33_v20 = vld [vmem:[%s3242_s0 + $0x50] sm:$0xff] }
   0x6   :  { %1552 = vmatpush.xpose.msk.msra.mxu0 %vm205_vm0, %v37_v4  ;;  %v51_v13 = vld [vmem:[%s3242_s0 + $0xe0] sm:$0xff]  ;;  %v50_v17 = vld [vmem:[%s3242_s0 + $0xd8] sm:$0xff]  ;;  %v49_v21 = vld [vmem:[%s3242_s0 + $0xd0] sm:$0xff] }
   0x7   :  { %1577 = vmatpush.xpose.msk.msra.mxu1 %vm205_vm0, %v53_v5  ;;  %v67_v14 = vld [vmem:[%s3242_s0 + $0x160] sm:$0xff]  ;;  %v66_v18 = vld [vmem:[%s3242_s0 + $0x158] sm:$0xff]  ;;  %v65_v22 = vld [vmem:[%s3242_s0 + $0x150] sm:$0xff] }
   0x8   :  { %1602 = vmatpush.xpose.msk.msra.mxu2 %vm205_vm0, %v69_v6  ;;  %v83_v15 = vld [vmem:[%s3242_s0 + $0x1e0] sm:$0xff]  ;;  %v82_v19 = vld [vmem:[%s3242_s0 + $0x1d8] sm:$0xff]  ;;  %v81_v23 = vld [vmem:[%s3242_s0 + $0x1d0] sm:$0xff] }
   0x9   :  { %1627 = vmatpush.xpose.msk.msra.mxu3 %vm205_vm0, %v85_v7  ;;  %v32_v24 = vld [vmem:[%s3242_s0 + $0x48] sm:$0xff]  ;;  %v31_v28 = vld [vmem:[%s3242_s0 + $0x40] sm:$0xff]  ;;  %v30_v32 = vld [vmem:[%s3242_s0 + $0x38] sm:$0xff] }
   0xa   :  { %1553 = vmatpush.xpose.msk.msra.mxu0 %vm205_vm0, %v36_v8  ;;  %v48_v25 = vld [vmem:[%s3242_s0 + $0xc8] sm:$0xff]  ;;  %v47_v29 = vld [vmem:[%s3242_s0 + $0xc0] sm:$0xff]  ;;  %v46_v33 = vld [vmem:[%s3242_s0 + $0xb8] sm:$0xff] }
   0xb   :  { %1578 = vmatpush.xpose.msk.msra.mxu1 %vm205_vm0, %v52_v9  ;;  %v64_v26 = vld [vmem:[%s3242_s0 + $0x148] sm:$0xff]  ;;  %v63_v30 = vld [vmem:[%s3242_s0 + $0x140] sm:$0xff]  ;;  %v62_v34 = vld [vmem:[%s3242_s0 + $0x138] sm:$0xff] }
   0xc   :  { %1603 = vmatpush.xpose.msk.msra.mxu2 %vm205_vm0, %v68_v10  ;;  %v80_v27 = vld [vmem:[%s3242_s0 + $0x1c8] sm:$0xff]  ;;  %v79_v31 = vld [vmem:[%s3242_s0 + $0x1c0] sm:$0xff]  ;;  %v78_v35 = vld [vmem:[%s3242_s0 + $0x1b8] sm:$0xff] }
   0xd   :  { %1628 = vmatpush.xpose.msk.msra.mxu3 %vm205_vm0, %v84_v11  ;;  %v29_v36 = vld [vmem:[%s3242_s0 + $0x30] sm:$0xff]  ;;  %v28_v40 = vld [vmem:[%s3242_s0 + $0x28] sm:$0xff]  ;;  %v151_v44 = vld [vmem:[%s3243_s2] sm:$0xff] }
   0xe   :  { %1554 = vmatpush.xpose.msk.msra.mxu0 %vm205_vm0, %v35_v12  ;;  %v45_v37 = vld [vmem:[%s3242_s0 + $0xb0] sm:$0xff]  ;;  %v44_v41 = vld [vmem:[%s3242_s0 + $0xa8] sm:$0xff]  ;;  %v27_v45 = vld [vmem:[%s3242_s0 + $0x20] sm:$0xff]  ;;  %162 = vperm.xlu0 %1785, %v151_v44  }
   0xf   :  { %1579 = vmatpush.xpose.msk.msra.mxu1 %vm205_vm0, %v51_v13  ;;  %v61_v38 = vld [vmem:[%s3242_s0 + $0x130] sm:$0xff]  ;;  %v60_v42 = vld [vmem:[%s3242_s0 + $0x128] sm:$0xff]  ;;  %v43_v46 = vld [vmem:[%s3242_s0 + $0xa0] sm:$0xff] }
  0x10   :  { %1604 = vmatpush.xpose.msk.msra.mxu2 %vm205_vm0, %v67_v14  ;;  %v77_v39 = vld [vmem:[%s3242_s0 + $0x1b0] sm:$0xff]  ;;  %v76_v43 = vld [vmem:[%s3242_s0 + $0x1a8] sm:$0xff]  ;;  %v59_v47 = vld [vmem:[%s3242_s0 + $0x120] sm:$0xff] }
  0x11   :  { %1629 = vmatpush.xpose.msk.msra.mxu3 %vm205_vm0, %v83_v15  ;;  %v75_v48 = vld [vmem:[%s3242_s0 + $0x1a0] sm:$0xff]  ;;  %v26_v50 = vld [vmem:[%s3242_s0 + $0x18] sm:$0xff]  ;;  %v25_v54 = vld [vmem:[%s3242_s0 + $0x10] sm:$0xff] }
  0x12   :  { %1555 = vmatpush.xpose.msk.msra.mxu0 %vm205_vm0, %v34_v16  ;;  %v42_v51 = vld [vmem:[%s3242_s0 + $0x98] sm:$0xff]  ;;  %v41_v55 = vld [vmem:[%s3242_s0 + $0x90] sm:$0xff]  ;;  %v24_v58 = vld [vmem:[%s3242_s0 + $0x8] sm:$0xff] }
  0x13   :  { %1580 = vmatpush.xpose.msk.msra.mxu1 %vm205_vm0, %v50_v17  ;;  %v58_v52 = vld [vmem:[%s3242_s0 + $0x118] sm:$0xff]  ;;  %v57_v56 = vld [vmem:[%s3242_s0 + $0x110] sm:$0xff]  ;;  %v40_v59 = vld [vmem:[%s3242_s0 + $0x88] sm:$0xff] }
  0x14   :  { %1605 = vmatpush.xpose.msk.msra.mxu2 %vm205_vm0, %v66_v18  ;;  %v74_v53 = vld [vmem:[%s3242_s0 + $0x198] sm:$0xff]  ;;  %v73_v57 = vld [vmem:[%s3242_s0 + $0x190] sm:$0xff]  ;;  %v56_v60 = vld [vmem:[%s3242_s0 + $0x108] sm:$0xff] }
  0x15   :  { %1630 = vmatpush.xpose.msk.msra.mxu3 %vm205_vm0, %v82_v19  ;;  %v72_v61 = vld [vmem:[%s3242_s0 + $0x188] sm:$0xff]  ;;  %v23_v63 = vld [vmem:[%s3242_s0] sm:$0xff]  ;;  %v134_v3 = vld [vmem:[%s3242_s0 + $0x378] sm:$0xff] }
  0x16   :  { %1556 = vmatpush.xpose.msk.msra.mxu0 %vm205_vm0, %v33_v20  ;;  %v152_v62 = vld [vmem:[%s3243_s2 + $0x8] sm:$0xff]  ;;  %v39_v0 = vld [vmem:[%s3242_s0 + $0x80] sm:$0xff]  ;;  %v150_v4 = vld [vmem:[%s3242_s0 + $0x3f8] sm:$0xff] }
  0x17   :  { %1581 = vmatpush.xpose.msk.msra.mxu1 %vm205_vm0, %v49_v21  ;;  %v55_v1 = vld [vmem:[%s3242_s0 + $0x100] sm:$0xff]  ;;  %167 = vperm.xlu0 %1785, %v152_v62   ;;  %v102_v6 = vld [vmem:[%s3242_s0 + $0x278] sm:$0xff]  ;;  %v133_v8 = vld [vmem:[%s3242_s0 + $0x370] sm:$0xff] }
  0x18   :  { %1606 = vmatpush.xpose.msk.msra.mxu2 %vm205_vm0, %v65_v22  ;;  %v71_v2 = vld [vmem:[%s3242_s0 + $0x180] sm:$0xff]  ;;  %v118_v7 = vld [vmem:[%s3242_s0 + $0x2f8] sm:$0xff]  ;;  %v149_v9 = vld [vmem:[%s3242_s0 + $0x3f0] sm:$0xff] }
  0x19   :  { %1631 = vmatpush.xpose.msk.msra.mxu3 %vm205_vm0, %v81_v23  ;;  %v2111_v5 = vld [vmem:[%s3244_s1] sm:$0xff]  ;;  %v153_v10 = vld [vmem:[%s3243_s2 + $0x10] sm:$0xff]  ;;  %v132_v13 = vld [vmem:[%s3242_s0 + $0x368] sm:$0xff] }
  0x1a   :  { %1557 = vmatpush.xpose.msk.msra.mxu0 %vm205_vm0, %v32_v24  ;;  %v101_v11 = vld [vmem:[%s3242_s0 + $0x270] sm:$0xff]  ;;  %v148_v14 = vld [vmem:[%s3242_s0 + $0x3e8] sm:$0xff]  ;;  %172 = vperm.xlu1 %1786, %v153_v10   ;;  %v131_v18 = vld [vmem:[%s3242_s0 + $0x360] sm:$0xff] }
  0x1b   :  { %1582 = vmatpush.xpose.msk.msra.mxu1 %vm205_vm0, %v48_v25  ;;  %v117_v12 = vld [vmem:[%s3242_s0 + $0x2f0] sm:$0xff]  ;;  %v2159_v15 = vld [vmem:[%s3244_s1 + $0x8] sm:$0xff]  ;;  %v147_v19 = vld [vmem:[%s3242_s0 + $0x3e0] sm:$0xff] }
  0x1c   :  { %1607 = vmatpush.xpose.msk.msra.mxu2 %vm205_vm0, %v64_v26  ;;  %v100_v16 = vld [vmem:[%s3242_s0 + $0x268] sm:$0xff]  ;;  %v154_v20 = vld [vmem:[%s3243_s2 + $0x18] sm:$0xff]  ;;  %v99_v21 = vld [vmem:[%s3242_s0 + $0x260] sm:$0xff] }
  0x1d   :  { %1632 = vmatpush.xpose.msk.msra.mxu3 %vm205_vm0, %v80_v27  ;;  %v116_v17 = vld [vmem:[%s3242_s0 + $0x2e8] sm:$0xff]  ;;  %v115_v22 = vld [vmem:[%s3242_s0 + $0x2e0] sm:$0xff]  ;;  %v130_v23 = vld [vmem:[%s3242_s0 + $0x358] sm:$0xff] }
  0x1e   :  { %1558 = vmatpush.xpose.msk.msra.mxu0 %vm205_vm0, %v31_v28  ;;  %v146_v24 = vld [vmem:[%s3242_s0 + $0x3d8] sm:$0xff]  ;;  %v2207_v25 = vld [vmem:[%s3244_s1 + $0x10] sm:$0xff]  ;;  %v136_v10 = vld [vmem:[%s3242_s0 + $0x388] sm:$0xff] }
  0x1f   :  { %1583 = vmatpush.xpose.msk.msra.mxu1 %vm205_vm0, %v47_v29  ;;  %v98_v26 = vld [vmem:[%s3242_s0 + $0x258] sm:$0xff]  ;;  %v129_v28 = vld [vmem:[%s3242_s0 + $0x350] sm:$0xff] }
  0x20   :  { %1608 = vmatpush.xpose.msk.msra.mxu2 %vm205_vm0, %v63_v30  ;;  %v114_v27 = vld [vmem:[%s3242_s0 + $0x2d8] sm:$0xff]  ;;  %v145_v29 = vld [vmem:[%s3242_s0 + $0x3d0] sm:$0xff] }
  0x21   :  { %1633 = vmatpush.xpose.msk.msra.mxu3 %vm205_vm0, %v79_v31  ;;  %v97_v30 = vld [vmem:[%s3242_s0 + $0x250] sm:$0xff]  ;;  %v94_v44 = vld [vmem:[%s3242_s0 + $0x238] sm:$0xff] }
  0x22   :  { %1559 = vmatpush.xpose.msk.msra.mxu0 %vm205_vm0, %v30_v32  ;;  %177 = vperm.xlu1 %1786, %v154_v20   ;;  %v113_v31 = vld [vmem:[%s3242_s0 + $0x2d0] sm:$0xff]  ;;  %v128_v32 = vld [vmem:[%s3242_s0 + $0x348] sm:$0xff]  ;;  %v158_v49 = vld [vmem:[%s3243_s2 + $0x38] sm:$0xff] }
  0x23   :  { %1584 = vmatpush.xpose.msk.msra.mxu1 %vm205_vm0, %v46_v33  ;;  %v144_v33 = vld [vmem:[%s3242_s0 + $0x3c8] sm:$0xff]  ;;  %v122_v62 = vld [vmem:[%s3242_s0 + $0x318] sm:$0xff]  ;;  %v159_v20 = vld [vmem:[%s3243_s2 + $0x40] sm:$0xff] }
  0x24   :  { %1609 = vmatpush.xpose.msk.msra.mxu2 %vm205_vm0, %v62_v34  ;;  %v2252_v34 = vld [vmem:[%s3244_s1 + $0x18] sm:$0xff] }
  0x25   :  { %1634 = vmatpush.xpose.msk.msra.mxu3 %vm205_vm0, %v78_v35  ;;  %v96_v35 = vld [vmem:[%s3242_s0 + $0x248] sm:$0xff] }
  0x26   :  { %1560 = vmatpush.xpose.msk.msra.mxu0 %vm205_vm0, %v29_v36  ;;  %v112_v36 = vld [vmem:[%s3242_s0 + $0x2c8] sm:$0xff] }
  0x27   :  { %1585 = vmatpush.xpose.msk.msra.mxu1 %vm205_vm0, %v45_v37  ;;  %v127_v37 = vld [vmem:[%s3242_s0 + $0x340] sm:$0xff] }
  0x28   :  { %1610 = vmatpush.xpose.msk.msra.mxu2 %vm205_vm0, %v61_v38  ;;  %v143_v38 = vld [vmem:[%s3242_s0 + $0x3c0] sm:$0xff] }
  0x29   :  { %1635 = vmatpush.xpose.msk.msra.mxu3 %vm205_vm0, %v77_v39  ;;  %v95_v39 = vld [vmem:[%s3242_s0 + $0x240] sm:$0xff] }
  0x2a   :  { %1561 = vmatpush.xpose.msk.msra.mxu0 %vm205_vm0, %v28_v40  ;;  %v111_v40 = vld [vmem:[%s3242_s0 + $0x2c0] sm:$0xff]  ;;  %197 = vperm.xlu1 %1786, %v158_v49  }
  0x2b   :  { %1586 = vmatpush.xpose.msk.msra.mxu1 %vm205_vm0, %v44_v41  ;;  %v126_v41 = vld [vmem:[%s3242_s0 + $0x338] sm:$0xff] }
  0x2c   :  { %1611 = vmatpush.xpose.msk.msra.mxu2 %vm205_vm0, %v60_v42  ;;  %v142_v42 = vld [vmem:[%s3242_s0 + $0x3b8] sm:$0xff] }
  0x2d   :  { %1636 = vmatpush.xpose.msk.msra.mxu3 %vm205_vm0, %v76_v43  ;;  %v2297_v43 = vld [vmem:[%s3244_s1 + $0x20] sm:$0xff] }
  0x2e   :  { %1562 = vmatpush.xpose.msk.msra.mxu0 %vm205_vm0, %v27_v45  ;;  %v110_v45 = vld [vmem:[%s3242_s0 + $0x2b8] sm:$0xff] }
  0x2f   :  { %1587 = vmatpush.xpose.msk.msra.mxu1 %vm205_vm0, %v43_v46  ;;  %v125_v46 = vld [vmem:[%s3242_s0 + $0x330] sm:$0xff] }
  0x30   :  { %1612 = vmatpush.xpose.msk.msra.mxu2 %vm205_vm0, %v59_v47  ;;  %v141_v47 = vld [vmem:[%s3242_s0 + $0x3b0] sm:$0xff] }
  0x31   :  { %1637 = vmatpush.xpose.msk.msra.mxu3 %vm205_vm0, %v75_v48  ;;  %v157_v48 = vld [vmem:[%s3243_s2 + $0x30] sm:$0xff] }
  0x32   :  { %1563 = vmatpush.xpose.msk.msra.mxu0 %vm205_vm0, %v26_v50  ;;  %v93_v50 = vld [vmem:[%s3242_s0 + $0x230] sm:$0xff]  ;;  %192 = vperm.xlu0 %1785, %v157_v48  }
  0x33   :  { %1588 = vmatpush.xpose.msk.msra.mxu1 %vm205_vm0, %v42_v51  ;;  %v109_v51 = vld [vmem:[%s3242_s0 + $0x2b0] sm:$0xff] }
  0x34   :  { %1613 = vmatpush.xpose.msk.msra.mxu2 %vm205_vm0, %v58_v52  ;;  %v124_v52 = vld [vmem:[%s3242_s0 + $0x328] sm:$0xff] }
  0x35   :  { %1638 = vmatpush.xpose.msk.msra.mxu3 %vm205_vm0, %v74_v53  ;;  %v140_v53 = vld [vmem:[%s3242_s0 + $0x3a8] sm:$0xff] }
  0x36   :  { %1564 = vmatpush.xpose.msk.msra.mxu0 %vm205_vm0, %v25_v54  ;;  %v2348_v54 = vld [vmem:[%s3244_s1 + $0x28] sm:$0xff] }
  0x37   :  { %1589 = vmatpush.xpose.msk.msra.mxu1 %vm205_vm0, %v41_v55  ;;  %v92_v55 = vld [vmem:[%s3242_s0 + $0x228] sm:$0xff] }
  0x38   :  { %1614 = vmatpush.xpose.msk.msra.mxu2 %vm205_vm0, %v57_v56  ;;  %v108_v56 = vld [vmem:[%s3242_s0 + $0x2a8] sm:$0xff] }
  0x39   :  { %1639 = vmatpush.xpose.msk.msra.mxu3 %vm205_vm0, %v73_v57  ;;  %v123_v57 = vld [vmem:[%s3242_s0 + $0x320] sm:$0xff] }
  0x3a   :  { %1565 = vmatpush.xpose.msk.msra.mxu0 %vm205_vm0, %v24_v58  ;;  %v139_v58 = vld [vmem:[%s3242_s0 + $0x3a0] sm:$0xff] }
  0x3b   :  { %1590 = vmatpush.xpose.msk.msra.mxu1 %vm205_vm0, %v40_v59  ;;  %v155_v59 = vld [vmem:[%s3243_s2 + $0x20] sm:$0xff] }
  0x3c   :  { %1615 = vmatpush.xpose.msk.msra.mxu2 %vm205_vm0, %v56_v60  ;;  %v91_v60 = vld [vmem:[%s3242_s0 + $0x220] sm:$0xff]  ;;  %182 = vperm.xlu2 %1787, %v155_v59  }
  0x3d   :  { %1640 = vmatpush.xpose.msk.msra.mxu3 %vm205_vm0, %v72_v61  ;;  %v107_v61 = vld [vmem:[%s3242_s0 + $0x2a0] sm:$0xff] }
  0x3e   :  { %1566 = vmatpush.xpose.msk.msra.mxu0 %vm205_vm0, %v23_v63  ;;  %v138_v63 = vld [vmem:[%s3242_s0 + $0x398] sm:$0xff] }
  0x3f   :  { %1591 = vmatpush.xpose.msk.msra.mxu1 %vm205_vm0, %v39_v0  ;;  %v2396_v0 = vld [vmem:[%s3244_s1 + $0x30] sm:$0xff] }
  0x40   :  { %1616 = vmatpush.xpose.msk.msra.mxu2 %vm205_vm0, %v55_v1  ;;  %v90_v1 = vld [vmem:[%s3242_s0 + $0x218] sm:$0xff] }
  0x41   :  { %1641 = vmatpush.xpose.msk.msra.mxu3 %vm205_vm0, %v71_v2  ;;  %1567 = vmatmul.msk.f32.vlgmr.msra.gmra.mxu0 %vm205_vm0, %v2111_v5  ;;  %v106_v2 = vld [vmem:[%s3242_s0 + $0x298] sm:$0xff] }
  0x42   :  { %1592 = vmatmul.msk.f32.vlgmr.msra.gmra.mxu1 %vm205_vm0, %v2111_v5  ;;  %1651 = vmatpush.xpose.msk.msrb.mxu0 %vm205_vm0, %v102_v6  ;;  %v156_v6 = vld [vmem:[%s3243_s2 + $0x28] sm:$0xff] }
  0x43   :  { %1617 = vmatmul.msk.f32.vlgmr.msra.gmra.mxu2 %vm205_vm0, %v2111_v5  ;;  %1676 = vmatpush.xpose.msk.msrb.mxu1 %vm205_vm0, %v118_v7  ;;  %v89_v7 = vld [vmem:[%s3242_s0 + $0x210] sm:$0xff] }
  0x44   :  { %1701 = vmatpush.xpose.msk.msrb.mxu2 %vm205_vm0, %v134_v3  ;;  %1642 = vmatmul.msk.f32.vlgmr.msra.gmra.mxu3 %vm205_vm0, %v2111_v5  ;;  %v121_v3 = vld [vmem:[%s3242_s0 + $0x310] sm:$0xff] }
  0x45   :  { %1726 = vmatpush.xpose.msk.msrb.mxu3 %vm205_vm0, %v150_v4  ;;  %v137_v4 = vld [vmem:[%s3242_s0 + $0x390] sm:$0xff]  ;;  %187 = vperm.xlu2 %1787, %v156_v6  }
  0x46   :  { %1652 = vmatpush.xpose.msk.msrb.mxu0 %vm205_vm0, %v101_v11  ;;  %v2444_v11 = vld [vmem:[%s3244_s1 + $0x38] sm:$0xff] }
  0x47   :  { %1677 = vmatpush.xpose.msk.msrb.mxu1 %vm205_vm0, %v117_v12  ;;  %v88_v12 = vld [vmem:[%s3242_s0 + $0x208] sm:$0xff] }
  0x48   :  { %1702 = vmatpush.xpose.msk.msrb.mxu2 %vm205_vm0, %v133_v8  ;;  %v105_v8 = vld [vmem:[%s3242_s0 + $0x290] sm:$0xff] }
  0x49   :  { %1727 = vmatpush.xpose.msk.msrb.mxu3 %vm205_vm0, %v149_v9  ;;  %1568 = vmatmul.msk.f32.gmra.mxu0 %vm205_vm0, %v2159_v15  ;;  %v120_v9 = vld [vmem:[%s3242_s0 + $0x308] sm:$0xff] }
  0x4a   :  { %1593 = vmatmul.msk.f32.gmra.mxu1 %vm205_vm0, %v2159_v15  ;;  %1653 = vmatpush.xpose.msk.msrb.mxu0 %vm205_vm0, %v100_v16  ;;  %v135_v16 = vld [vmem:[%s3242_s0 + $0x380] sm:$0xff] }
  0x4b   :  { %1618 = vmatmul.msk.f32.gmra.mxu2 %vm205_vm0, %v2159_v15  ;;  %1678 = vmatpush.xpose.msk.msrb.mxu1 %vm205_vm0, %v116_v17  ;;  %v87_v17 = vld [vmem:[%s3242_s0 + $0x200] sm:$0xff] }
  0x4c   :  { %1703 = vmatpush.xpose.msk.msrb.mxu2 %vm205_vm0, %v132_v13  ;;  %1643 = vmatmul.msk.f32.gmra.mxu3 %vm205_vm0, %v2159_v15  ;;  %v104_v13 = vld [vmem:[%s3242_s0 + $0x288] sm:$0xff] }
  0x4d   :  { %1728 = vmatpush.xpose.msk.msrb.mxu3 %vm205_vm0, %v148_v14  ;;  %v119_v14 = vld [vmem:[%s3242_s0 + $0x300] sm:$0xff]  ;;  %202 = vperm.xlu2 %1787, %v159_v20  }
  0x4e   :  { %1654 = vmatpush.xpose.msk.msrb.mxu0 %vm205_vm0, %v99_v21 }
  0x4f   :  { %1679 = vmatpush.xpose.msk.msrb.mxu1 %vm205_vm0, %v115_v22 }
  0x50   :  { %1704 = vmatpush.xpose.msk.msrb.mxu2 %vm205_vm0, %v131_v18  ;;  %v103_v18 = vld [vmem:[%s3242_s0 + $0x280] sm:$0xff] }
  0x51   :  { %1729 = vmatpush.xpose.msk.msrb.mxu3 %vm205_vm0, %v147_v19  ;;  %1569 = vmatmul.msk.f32.gmra.mxu0 %vm205_vm0, %v2207_v25  ;;  %v2483_v19 = vld [vmem:[%s3244_s1 + $0x40] sm:$0xff] }
  0x52   :  { %1594 = vmatmul.msk.f32.gmra.mxu1 %vm205_vm0, %v2207_v25  ;;  %1655 = vmatpush.xpose.msk.msrb.mxu0 %vm205_vm0, %v98_v26 }
  0x53   :  { %1619 = vmatmul.msk.f32.gmra.mxu2 %vm205_vm0, %v2207_v25  ;;  %1680 = vmatpush.xpose.msk.msrb.mxu1 %vm205_vm0, %v114_v27 }
  0x54   :  { %1705 = vmatpush.xpose.msk.msrb.mxu2 %vm205_vm0, %v130_v23  ;;  %1644 = vmatmul.msk.f32.gmra.mxu3 %vm205_vm0, %v2207_v25 }
  0x55   :  { %1730 = vmatpush.xpose.msk.msrb.mxu3 %vm205_vm0, %v146_v24 }
  0x56   :  { %1656 = vmatpush.xpose.msk.msrb.mxu0 %vm205_vm0, %v97_v30 }
  0x57   :  { %1681 = vmatpush.xpose.msk.msrb.mxu1 %vm205_vm0, %v113_v31 }
  0x58   :  { %1706 = vmatpush.xpose.msk.msrb.mxu2 %vm205_vm0, %v129_v28 }
  0x59   :  { %1731 = vmatpush.xpose.msk.msrb.mxu3 %vm205_vm0, %v145_v29  ;;  %1570 = vmatmul.msk.f32.gmra.mxu0 %vm205_vm0, %v2252_v34 }
  0x5a   :  { %1595 = vmatmul.msk.f32.gmra.mxu1 %vm205_vm0, %v2252_v34  ;;  %1657 = vmatpush.xpose.msk.msrb.mxu0 %vm205_vm0, %v96_v35 }
  0x5b   :  { %1620 = vmatmul.msk.f32.gmra.mxu2 %vm205_vm0, %v2252_v34  ;;  %1682 = vmatpush.xpose.msk.msrb.mxu1 %vm205_vm0, %v112_v36 }
  0x5c   :  { %1707 = vmatpush.xpose.msk.msrb.mxu2 %vm205_vm0, %v128_v32  ;;  %1645 = vmatmul.msk.f32.gmra.mxu3 %vm205_vm0, %v2252_v34  ;;  %v1201_v32 = vlaneseq }
  0x5d   :  { %1732 = vmatpush.xpose.msk.msrb.mxu3 %vm205_vm0, %v144_v33 }
  0x5e   :  { %1658 = vmatpush.xpose.msk.msrb.mxu0 %vm205_vm0, %v95_v39 }
  0x5f   :  { %1683 = vmatpush.xpose.msk.msrb.mxu1 %vm205_vm0, %v111_v40 }
  0x60   :  { %1708 = vmatpush.xpose.msk.msrb.mxu2 %vm205_vm0, %v127_v37 }
  0x61   :  { %1733 = vmatpush.xpose.msk.msrb.mxu3 %vm205_vm0, %v143_v38  ;;  %1571 = vmatmul.msk.f32.gmra.mxu0 %vm205_vm0, %v2297_v43 }
  0x62   :  { %1596 = vmatmul.msk.f32.gmra.mxu1 %vm205_vm0, %v2297_v43  ;;  %1659 = vmatpush.xpose.msk.msrb.mxu0 %vm205_vm0, %v94_v44 }
  0x63   :  { %1621 = vmatmul.msk.f32.gmra.mxu2 %vm205_vm0, %v2297_v43  ;;  %1684 = vmatpush.xpose.msk.msrb.mxu1 %vm205_vm0, %v110_v45 }
  0x64   :  { %1709 = vmatpush.xpose.msk.msrb.mxu2 %vm205_vm0, %v126_v41  ;;  %1646 = vmatmul.msk.f32.gmra.mxu3 %vm205_vm0, %v2297_v43 }
  0x65   :  { %1734 = vmatpush.xpose.msk.msrb.mxu3 %vm205_vm0, %v142_v42 }
  0x66   :  { %1660 = vmatpush.xpose.msk.msrb.mxu0 %vm205_vm0, %v93_v50 }
  0x67   :  { %1685 = vmatpush.xpose.msk.msrb.mxu1 %vm205_vm0, %v109_v51 }
  0x68   :  { %1710 = vmatpush.xpose.msk.msrb.mxu2 %vm205_vm0, %v125_v46 }
  0x69   :  { %1735 = vmatpush.xpose.msk.msrb.mxu3 %vm205_vm0, %v141_v47  ;;  %1572 = vmatmul.msk.f32.gmra.mxu0 %vm205_vm0, %v2348_v54 }
  0x6a   :  { %1597 = vmatmul.msk.f32.gmra.mxu1 %vm205_vm0, %v2348_v54  ;;  %1661 = vmatpush.xpose.msk.msrb.mxu0 %vm205_vm0, %v92_v55 }
  0x6b   :  { %1622 = vmatmul.msk.f32.gmra.mxu2 %vm205_vm0, %v2348_v54  ;;  %1686 = vmatpush.xpose.msk.msrb.mxu1 %vm205_vm0, %v108_v56 }
  0x6c   :  { %1711 = vmatpush.xpose.msk.msrb.mxu2 %vm205_vm0, %v124_v52  ;;  %1647 = vmatmul.msk.f32.gmra.mxu3 %vm205_vm0, %v2348_v54 }
  0x6d   :  { %1736 = vmatpush.xpose.msk.msrb.mxu3 %vm205_vm0, %v140_v53 }
  0x6e   :  { %1662 = vmatpush.xpose.msk.msrb.mxu0 %vm205_vm0, %v91_v60 }
  0x6f   :  { %1687 = vmatpush.xpose.msk.msrb.mxu1 %vm205_vm0, %v107_v61 }
  0x70   :  { %1712 = vmatpush.xpose.msk.msrb.mxu2 %vm205_vm0, %v123_v57 }
  0x71   :  { %1737 = vmatpush.xpose.msk.msrb.mxu3 %vm205_vm0, %v139_v58  ;;  %1573 = vmatmul.msk.f32.gmra.mxu0 %vm205_vm0, %v2396_v0 }
  0x72   :  { %1598 = vmatmul.msk.f32.gmra.mxu1 %vm205_vm0, %v2396_v0  ;;  %1663 = vmatpush.xpose.msk.msrb.mxu0 %vm205_vm0, %v90_v1 }
  0x73   :  { %1623 = vmatmul.msk.f32.gmra.mxu2 %vm205_vm0, %v2396_v0  ;;  %1688 = vmatpush.xpose.msk.msrb.mxu1 %vm205_vm0, %v106_v2 }
  0x74   :  { %1713 = vmatpush.xpose.msk.msrb.mxu2 %vm205_vm0, %v122_v62  ;;  %1648 = vmatmul.msk.f32.gmra.mxu3 %vm205_vm0, %v2396_v0 }
  0x75   :  { %1738 = vmatpush.xpose.msk.msrb.mxu3 %vm205_vm0, %v138_v63 }
  0x76   :  { %1664 = vmatpush.xpose.msk.msrb.mxu0 %vm205_vm0, %v89_v7 }
  0x77   :  { %1689 = vmatpush.xpose.msk.msrb.mxu1 %vm205_vm0, %v105_v8 }
  0x78   :  { %1714 = vmatpush.xpose.msk.msrb.mxu2 %vm205_vm0, %v121_v3 }
  0x79   :  { %1739 = vmatpush.xpose.msk.msrb.mxu3 %vm205_vm0, %v137_v4  ;;  %1574 = vmatmul.msk.f32.gmra.mxu0 %vm205_vm0, %v2444_v11 }
  0x7a   :  { %1599 = vmatmul.msk.f32.gmra.mxu1 %vm205_vm0, %v2444_v11  ;;  %1665 = vmatpush.xpose.msk.msrb.mxu0 %vm205_vm0, %v88_v12 }
  0x7b   :  { %1624 = vmatmul.msk.f32.gmra.mxu2 %vm205_vm0, %v2444_v11  ;;  %1690 = vmatpush.xpose.msk.msrb.mxu1 %vm205_vm0, %v104_v13 }
  0x7c   :  { %1715 = vmatpush.xpose.msk.msrb.mxu2 %vm205_vm0, %v120_v9  ;;  %1649 = vmatmul.msk.f32.gmra.mxu3 %vm205_vm0, %v2444_v11 }
  0x7d   :  { %1740 = vmatpush.xpose.msk.msrb.mxu3 %vm205_vm0, %v136_v10 }
  0x7e   :  { %1666 = vmatpush.xpose.msk.msrb.mxu0 %vm205_vm0, %v87_v17 }
  0x7f   :  { %1691 = vmatpush.xpose.msk.msrb.mxu1 %vm205_vm0, %v103_v18 }
  0x80   :  { %1716 = vmatpush.xpose.msk.msrb.mxu2 %vm205_vm0, %v119_v14 }
  0x81   :  { %1741 = vmatpush.xpose.msk.msrb.mxu3 %vm205_vm0, %v135_v16  ;;  %1575 = vmatmul.msk.f32.gmra.mxu0 %vm205_vm0, %v2483_v19 }
  0x82   :  { %1600 = vmatmul.msk.f32.gmra.mxu1 %vm205_vm0, %v2483_v19 }
  0x83   :  { %1625 = vmatmul.msk.f32.gmra.mxu2 %vm205_vm0, %v2483_v19 }
  0x84   :  { %1650 = vmatmul.msk.f32.gmra.mxu3 %vm205_vm0, %v2483_v19 }
  0x89   :  { %1667 = vmatmul.msk.f32.vlgmr.msrb.gmra.mxu0 %vm205_vm0, %v2111_v5 }
  0x8a   :  { %1692 = vmatmul.msk.f32.vlgmr.msrb.gmra.mxu1 %vm205_vm0, %v2111_v5 }
  0x8b   :  { %1717 = vmatmul.msk.f32.vlgmr.msrb.gmra.mxu2 %vm205_vm0, %v2111_v5 }
  0x8c   :  { %1742 = vmatmul.msk.f32.vlgmr.msrb.gmra.mxu3 %vm205_vm0, %v2111_v5  ;;  %v2554_v5 = vpop.permute.xlu0 %162  ;;  %v2590_v4 = vpop.permute.xlu1 %172 }
  0x8d   :  { %3260 = vst [vmem:[#allocation2_spill] sm:$0xff] %v2554_v5 }
  0x91   :  { %1668 = vmatmul.msk.f32.gmra.mxu0 %vm205_vm0, %v2159_v15 }
  0x92   :  { %1693 = vmatmul.msk.f32.gmra.mxu1 %vm205_vm0, %v2159_v15 }
  0x93   :  { %1718 = vmatmul.msk.f32.gmra.mxu2 %vm205_vm0, %v2159_v15 }
  0x94   :  { %1743 = vmatmul.msk.f32.gmra.mxu3 %vm205_vm0, %v2159_v15  ;;  %v2592_v8 = vpop.permute.xlu0 %167 }
  0x95   :  { %3263 = vst [vmem:[#allocation5_spill] sm:$0xff] %v2592_v8 }
  0x99   :  { %1669 = vmatmul.msk.f32.gmra.mxu0 %vm205_vm0, %v2207_v25 }
  0x9a   :  { %1694 = vmatmul.msk.f32.gmra.mxu1 %vm205_vm0, %v2207_v25 }
  0x9b   :  { %1719 = vmatmul.msk.f32.gmra.mxu2 %vm205_vm0, %v2207_v25 }
  0x9c   :  { %1744 = vmatmul.msk.f32.gmra.mxu3 %vm205_vm0, %v2207_v25 }
  0xa1   :  { %1670 = vmatmul.msk.f32.gmra.mxu0 %vm205_vm0, %v2252_v34 }
  0xa2   :  { %1695 = vmatmul.msk.f32.gmra.mxu1 %vm205_vm0, %v2252_v34 }
  0xa3   :  { %1720 = vmatmul.msk.f32.gmra.mxu2 %vm205_vm0, %v2252_v34 }
  0xa4   :  { %1745 = vmatmul.msk.f32.gmra.mxu3 %vm205_vm0, %v2252_v34 }
  0xa9   :  { %1671 = vmatmul.msk.f32.gmra.mxu0 %vm205_vm0, %v2297_v43 }
  0xaa   :  { %1696 = vmatmul.msk.f32.gmra.mxu1 %vm205_vm0, %v2297_v43 }
  0xab   :  { %1721 = vmatmul.msk.f32.gmra.mxu2 %vm205_vm0, %v2297_v43 }
  0xac   :  { %1746 = vmatmul.msk.f32.gmra.mxu3 %vm205_vm0, %v2297_v43  ;;  %v2577_v43 = vshrl.u32 %v1201_v32, 7 }
  0xae   :  { %3261 = vst [vmem:[#allocation3_spill] sm:$0xff] %v2577_v43 }
  0xb1   :  { %1672 = vmatmul.msk.f32.gmra.mxu0 %vm205_vm0, %v2348_v54 }
  0xb2   :  { %1697 = vmatmul.msk.f32.gmra.mxu1 %vm205_vm0, %v2348_v54 }
  0xb3   :  { %1722 = vmatmul.msk.f32.gmra.mxu2 %vm205_vm0, %v2348_v54 }
  0xb4   :  { %1747 = vmatmul.msk.f32.gmra.mxu3 %vm205_vm0, %v2348_v54 }
  0xb9   :  { %1673 = vmatmul.msk.f32.gmra.mxu0 %vm205_vm0, %v2396_v0 }
  0xba   :  { %1698 = vmatmul.msk.f32.gmra.mxu1 %vm205_vm0, %v2396_v0 }
  0xbb   :  { %1723 = vmatmul.msk.f32.gmra.mxu2 %vm205_vm0, %v2396_v0 }
  0xbc   :  { %1748 = vmatmul.msk.f32.gmra.mxu3 %vm205_vm0, %v2396_v0 }
  0xbe   :  { %v634_v15 = vpop.f32.mrf.mxu0 }
  0xbf   :  { %v678_v21 = vpop.f32.mrf.mxu1  ;;  %v635_v22 = vadd.f32 %v634_v15, %v2554_v5 }
  0xc0   :  { %v679_v23 = vadd.f32 %v678_v21, %v2554_v5 }
  0xc1   :  { %v969_v24 = vrot.slane %v635_v22, 4  ;;  %1674 = vmatmul.msk.f32.gmra.mxu0 %vm205_vm0, %v2444_v11 }
  0xc2   :  { %v975_v25 = vrot.slane %v679_v23, 4  ;;  %1699 = vmatmul.msk.f32.gmra.mxu1 %vm205_vm0, %v2444_v11 }
  0xc3   :  { %1724 = vmatmul.msk.f32.gmra.mxu2 %vm205_vm0, %v2444_v11  ;;  %v970_v26 = vmax.f32 %v635_v22, %v969_v24 }
  0xc4   :  { %1749 = vmatmul.msk.f32.gmra.mxu3 %vm205_vm0, %v2444_v11  ;;  %v976_v27 = vmax.f32 %v679_v23, %v975_v25 }
  0xc5   :  { %v971_v28 = vrot.slane %v970_v26, 2 }
  0xc6   :  { %v977_v29 = vrot.slane %v976_v27, 2  ;;  %v722_v30 = vpop.f32.mrf.mxu2  ;;  %v637_v35 = vpop.f32.mrf.mxu0 }
  0xc7   :  { %v766_v31 = vpop.f32.mrf.mxu3  ;;  %v723_v33 = vadd.f32 %v722_v30, %v2554_v5  ;;  %v2570_v36 = vpop.f32.mrf.mxu1  ;;  %v972_v37 = vmax.f32 %v970_v26, %v971_v28  ;;  %v2602_v20 = vadd.f32 %v637_v35, %v2592_v8 }
  0xc8   :  { %v2568_v34 = vadd.f32 %v766_v31, %v2554_v5  ;;  %v978_v38 = vmax.f32 %v976_v27, %v977_v29  ;;  %v2612_v30 = vadd.f32 %v2570_v36, %v2592_v8 }
  0xc9   :  { %v981_v39 = vrot.slane %v723_v33, 4  ;;  %v973_v41 = vrot.slane %v972_v37, 1  ;;  %1675 = vmatmul.msk.f32.gmra.mxu0 %vm205_vm0, %v2483_v19 }
  0xca   :  { %v987_v40 = vrot.slane %v2568_v34, 4  ;;  %v979_v42 = vrot.slane %v978_v38, 1  ;;  %1700 = vmatmul.msk.f32.gmra.mxu1 %vm205_vm0, %v2483_v19 }
  0xcb   :  { %v982_v44 = vmax.f32 %v723_v33, %v981_v39  ;;  %1725 = vmatmul.msk.f32.gmra.mxu2 %vm205_vm0, %v2483_v19  ;;  %v974_v46 = vmax.f32 %v972_v37, %v973_v41  ;;  %v2627_v41 = vpop.permute.xlu1 %177 }
  0xcc   :  { %v988_v45 = vmax.f32 %v2568_v34, %v987_v40  ;;  %1750 = vmatmul.msk.f32.gmra.mxu3 %vm205_vm0, %v2483_v19  ;;  %v980_v47 = vmax.f32 %v978_v38, %v979_v42  ;;  %3268 = vst [vmem:[#allocation6_spill] sm:$0xff] %v2627_v41 }
  0xcd   :  { %v983_v48 = vrot.slane %v982_v44, 2  ;;  %v1017_v50 = vsub.f32 %v635_v22, %v974_v46  ;;  %vm1203_vm1 = vcmp.eq.f32.partialorder %v635_v22, %v974_v46 }
  0xce   :  { %v989_v49 = vrot.slane %v988_v45, 2  ;;  %v1018_v51 = vsub.f32 %v679_v23, %v980_v47  ;;  %vm1204_vm2 = vcmp.eq.f32.partialorder %v679_v23, %v980_v47  ;;  %v725_v52 = vpop.f32.mrf.mxu2  ;;  %v1211_v54 = vsel %vm1203_vm1, %v2577_v43, 8  ;;  %v2586_v58 = vpop.f32.mrf.mxu0 }
  0xcf   :  { %v769_v53 = vpop.f32.mrf.mxu3  ;;  %v1212_v55 = vsel %vm1204_vm2, %v2577_v43, 8  ;;  %v984_v56 = vmax.f32 %v982_v44, %v983_v48  ;;  %v2588_v59 = vpop.f32.mrf.mxu1  ;;  %v1025_v60 = vmul.f32 1.442695, %v1017_v50  ;;  %v1219_v61 = vrot.slane %v1211_v54, 4 }
  0xd0   :  { %v990_v57 = vmax.f32 %v988_v45, %v989_v49  ;;  %3262 = vst [vmem:[#allocation4_spill] sm:$0xff] %v2588_v59  ;;  %v1027_v62 = vmul.f32 1.442695, %v1018_v51  ;;  %v1228_v63 = vrot.slane %v1212_v55, 4  ;;  %v2617_v37 = vadd.f32 %v725_v52, %v2592_v8 }
  0xd1   :  { %v985_v0 = vrot.slane %v984_v56, 1  ;;  %1788 = vpow2.f32 %v1025_v60  ;;  %vm1220_vm3 = vcmp.lt.s32.totalorder %v1211_v54, %v1219_v61  ;;  %v2620_v38 = vadd.f32 %v769_v53, %v2592_v8 }
  0xd2   :  { %v991_v1 = vrot.slane %v990_v57, 1  ;;  %vm1229_vm4 = vcmp.lt.s32.totalorder %v1212_v55, %v1228_v63  ;;  %v1221_v2 = vsel %vm1220_vm3, %v1211_v54, %v1219_v61  ;;  %1790 = vpow2.f32 %v1027_v62  ;;  %v2637_v54 = vpop.permute.xlu2 %182 }
  0xd3   :  { %v986_v3 = vmax.f32 %v984_v56, %v985_v0  ;;  %v1222_v6 = vrot.slane %v1221_v2, 2  ;;  %v2594_v9 = vsel %vm1229_vm4, %v1212_v55, %v1228_v63  ;;  %3270 = vst [vmem:[#allocation8_spill] sm:$0xff] %v2637_v54 }
  0xd4   :  { %v992_v7 = vmax.f32 %v990_v57, %v991_v1  ;;  %v1231_v22 = vrot.slane %v2594_v9, 2 }
  0xd5   :  { %v1019_v10 = vsub.f32 %v723_v33, %v986_v3  ;;  %vm1205_vm5 = vcmp.eq.f32.partialorder %v723_v33, %v986_v3  ;;  %vm2604_vm7 = vcmp.lt.s32.totalorder %v1221_v2, %v1222_v6 }
  0xd6   :  { %v1213_v11 = vsel %vm1205_vm5, %v2577_v43, 8  ;;  %v1020_v12 = vsub.f32 %v2568_v34, %v992_v7  ;;  %v728_v13 = vpop.f32.mrf.mxu2  ;;  %vm1206_vm6 = vcmp.eq.f32.partialorder %v2568_v34, %v992_v7  ;;  %v643_v18 = vpop.f32.mrf.mxu0  ;;  %v1224_v33 = vsel %vm2604_vm7, %v1221_v2, %v1222_v6 }
  0xd7   :  { %v772_v14 = vpop.f32.mrf.mxu3  ;;  %v1029_v16 = vmul.f32 1.442695, %v1019_v10  ;;  %v1237_v17 = vrot.slane %v1213_v11, 4  ;;  %v2599_v19 = vpop.f32.mrf.mxu1  ;;  %v1214_v24 = vsel %vm1206_vm6, %v2577_v43, 8  ;;  %vm2623_vm10 = vcmp.lt.s32.totalorder %v2594_v9, %v1231_v22 }
  0xd8   :  { %v1789_v15 = vpop.eup %1788  ;;  %v1031_v23 = vmul.f32 1.442695, %v1020_v12  ;;  %v1246_v27 = vrot.slane %v1214_v24, 4  ;;  %v2630_v45 = vadd.f32 %v728_v13, %v2590_v4  ;;  %v1225_v48 = vrot.slane %v1224_v33, 1 }
  0xd9   :  { %v1791_v25 = vpop.eup %1790  ;;  %v1041_v26 = vrot.slane %v1789_v15, 4  ;;  %1792 = vpow2.f32 %v1029_v16  ;;  %vm1238_vm8 = vcmp.lt.s32.totalorder %v1213_v11, %v1237_v17  ;;  %v2633_v52 = vadd.f32 %v772_v14, %v2590_v4 }
  0xda   :  { %v1047_v28 = vrot.slane %v1791_v25, 4  ;;  %v1239_v29 = vsel %vm1238_vm8, %v1213_v11, %v1237_v17  ;;  %1794 = vpow2.f32 %v1031_v23  ;;  %vm1247_vm9 = vcmp.lt.s32.totalorder %v1214_v24, %v1246_v27 }
  0xdb   :  { %v1042_v31 = vadd.f32 %v1789_v15, %v1041_v26  ;;  %v1240_v32 = vrot.slane %v1239_v29, 2  ;;  %v1248_v35 = vsel %vm1247_vm9, %v1214_v24, %v1246_v27  ;;  %v2642_v62 = vadd.f32 %v643_v18, %v2627_v41 }
  0xdc   :  { %v1048_v34 = vadd.f32 %v1791_v25, %v1047_v28  ;;  %v1249_v36 = vrot.slane %v1248_v35, 2  ;;  %vm1226_vm14 = vcmp.lt.s32.totalorder %v1224_v33, %v1225_v48  ;;  %v2647_v6 = vsel %vm2623_vm10, %v2594_v9, %v1231_v22 }
  0xdd   :  { %v1043_v39 = vrot.slane %v1042_v31, 2  ;;  %vm1241_vm11 = vcmp.lt.s32.totalorder %v1239_v29, %v1240_v32  ;;  %v2659_v16 = vadd.f32 %v2599_v19, %v2627_v41  ;;  %v2662_v9 = vsel %vm1226_vm14, %v1224_v33, %v1225_v48 }
  0xde   :  { %v1049_v42 = vrot.slane %v1048_v34, 2  ;;  %v1242_v44 = vsel %vm1241_vm11, %v1239_v29, %v1240_v32  ;;  %v731_v46 = vpop.f32.mrf.mxu2  ;;  %vm1250_vm12 = vcmp.lt.s32.totalorder %v1248_v35, %v1249_v36  ;;  %v2635_v53 = vpop.f32.mrf.mxu0  ;;  %v3250_v28 = vmov 0.0  }
  0xdf   :  { %v775_v47 = vpop.f32.mrf.mxu3  ;;  %v1793_v49 = vpop.eup %1792  ;;  %v1044_v50 = vadd.f32 %v1043_v39, %v1042_v31  ;;  %v1243_v51 = vrot.slane %v1242_v44, 1  ;;  %3269 = vst [vmem:[#allocation7_spill] sm:$0xff] %v2635_v53  ;;  %v1251_v60 = vsel %vm1250_vm12, %v1248_v35, %v1249_v36  ;;  %v2668_v21 = vadd.f32 %v731_v46, %v2627_v41 }
  0xe0   :  { %v1795_v55 = vpop.eup %1794  ;;  %v1050_v56 = vadd.f32 %v1049_v42, %v1048_v34  ;;  %v1053_v57 = vrot.slane %v1793_v49, 4  ;;  %v2639_v61 = vpop.f32.mrf.mxu1  ;;  %v1252_v1 = vrot.slane %v1251_v60, 1  ;;  %3272 = vst [vmem:[#allocation10_spill] sm:$0xff] %v2659_v16  ;;  %v2673_v24 = vadd.f32 %v775_v47, %v2627_v41 }
  0xe1   :  { %3271 = vst [vmem:[#allocation9_spill] sm:$0xff] %v2639_v61  ;;  %v1045_v63 = vrot.slane %v1044_v50, 1  ;;  %v1059_v0 = vrot.slane %v1795_v55, 4  ;;  %vm1244_vm13 = vcmp.lt.s32.totalorder %v1242_v44, %v1243_v51  ;;  %v2688_v32 = vpop.permute.xlu2 %187  ;;  %vm1291_vm6 = vcmp.eq.s32.totalorder %v2662_v9, 0 }
  0xe2   :  { %v1051_v2 = vrot.slane %v1050_v56, 1  ;;  %v1054_v3 = vadd.f32 %v1793_v49, %v1053_v57  ;;  %v2651_v11 = vsel %vm1244_vm13, %v1242_v44, %v1243_v51  ;;  %vm1253_vm15 = vcmp.lt.s32.totalorder %v1251_v60, %v1252_v1  ;;  %3273 = vst [vmem:[#allocation11_spill] sm:$0xff] %v2688_v32 }
  0xe3   :  { %v2649_v7 = vadd.f32 %v1045_v63, %v1044_v50  ;;  %v1060_v10 = vadd.f32 %v1795_v55, %v1059_v0  ;;  %v2655_v14 = vsel %vm1253_vm15, %v1251_v60, %v1252_v1  ;;  %vm1293_vm0 = vcmp.eq.s32.totalorder %v2651_v11, 0 }
  0xe4   :  { %v2653_v12 = vadd.f32 %v1051_v2, %v1050_v56  ;;  %v1055_v13 = vrot.slane %v1054_v3, 2  ;;  %vm1294_vm1 = vcmp.eq.s32.totalorder %v2655_v14, 0  ;;  %vm1341_vm2 = vcmp.eq.s32.totalorder %v2651_v11, 1 }
  0xe5   :  { %1796 = vrcp.f32 %v2649_v7  ;;  %v1061_v17 = vrot.slane %v1060_v10, 2  ;;  %vm1342_vm3 = vcmp.eq.s32.totalorder %v2655_v14, 1  ;;  %vm1405_vm4 = vcmp.eq.s32.totalorder %v2651_v11, 2 }
  0xe6   :  { %v1056_v15 = vadd.f32 %v1055_v13, %v1054_v3  ;;  %v734_v22 = vpop.f32.mrf.mxu2  ;;  %1798 = vrcp.f32 %v2653_v12  ;;  %v649_v25 = vpop.f32.mrf.mxu0  ;;  %vm1406_vm5 = vcmp.eq.s32.totalorder %v2655_v14, 2  ;;  %v2681_v29 = vsel %vm1293_vm0, 1.0, %v3250_v28 }
  0xe7   :  { %v778_v23 = vpop.f32.mrf.mxu3  ;;  %v1062_v19 = vadd.f32 %v1061_v17, %v1060_v10  ;;  %v2686_v31 = vsel %vm1294_vm1, 1.0, %v3250_v28  ;;  %v2694_v34 = vsel %vm1341_vm2, 1.0, %v3250_v28  ;;  %v2697_v35 = vadd.f32 %v734_v22, %v2637_v54 }
  0xe8   :  { %v1057_v26 = vrot.slane %v1056_v15, 1  ;;  %v2700_v39 = vadd.f32 %v778_v23, %v2637_v54  ;;  %v693_v40 = vpop.f32.mrf.mxu1  ;;  %v2709_v44 = vsel %vm1342_vm3, 1.0, %v3250_v28  ;;  %v2714_v46 = vsel %vm1405_vm4, 1.0, %v3250_v28 }
  0xe9   :  { %v1063_v27 = vrot.slane %v1062_v19, 1  ;;  %v2719_v47 = vsel %vm1406_vm5, 1.0, %v3250_v28  ;;  %v2724_v49 = vadd.f32 %v649_v25, %v2688_v32  ;;  %vm1094_vm7 = vweird.f32 %v2649_v7 }
  0xea   :  { %v2691_v33 = vadd.f32 %v1057_v26, %v1056_v15  ;;  %v1098_v55 = vand.u32 2147483647, %v2649_v7  ;;  %v1100_v56 = vand.u32 2147483648, %v2649_v7  ;;  %v1751_v0 = vsel %vm1291_vm6, 1.0, %v3250_v28 }
  0xeb   :  { %v2702_v36 = vpop.eup %1796  ;;  %v2704_v42 = vadd.f32 %v1063_v27, %v1062_v19  ;;  %vm1339_vm8 = vcmp.eq.s32.totalorder %v2662_v9, 1  ;;  %vm1403_vm9 = vcmp.eq.s32.totalorder %v2662_v9, 2  ;;  %vm1467_vm13 = vcmp.eq.s32.totalorder %v2662_v9, 3 }
  0xec   :  { %1800 = vrcp.f32 %v2691_v33  ;;  %v1128_v48 = vand.u32 2147483648, %v2691_v33  ;;  %v2727_v50 = vpop.eup %1798  ;;  %v1090_v63 = vmul.f32 %v2702_v36, %v2649_v7  ;;  %v1126_v1 = vand.u32 2147483647, %v2691_v33 }
  0xed   :  { %1802 = vrcp.f32 %v2704_v42  ;;  %v1142_v51 = vand.u32 2147483648, %v2704_v42  ;;  %v1140_v3 = vand.u32 2147483647, %v2704_v42  ;;  %vm1095_vm10 = vweird.f32 %v2702_v36 }
  0xee   :  { %v737_v57 = vpop.f32.mrf.mxu2  ;;  %v2741_v2 = vor.u32 1.1754944e-38, %v1128_v48  ;;  %v2744_v10 = vpop.f32.mrf.mxu0  ;;  %v1091_v22 = vsub.f32 1.0, %v1090_v63  ;;  %vm1122_vm11 = vweird.f32 %v2691_v33  ;;  %vm2756_vm12 = vcmp.eq.f32.partialorder %v1098_v55, 8.507059e+37  ;;  %vm1096_vm4 = vmor %vm1094_vm7, %vm1095_vm10 }
  0xef   :  { %v781_v60 = vpop.f32.mrf.mxu3  ;;  %3274 = vst [vmem:[#allocation12_spill] sm:$0xff] %v2744_v10  ;;  %v2747_v13 = vor.u32 1.1754944e-38, %v1142_v51  ;;  %v2750_v17 = vadd.f32 %v737_v57, %v2688_v32  ;;  %v1101_v19 = vor.u32 1.1754944e-38, %v1100_v56  ;;  %v1104_v25 = vmul.f32 %v2727_v50, %v2653_v12 }
  0xf0   :  { %v2753_v15 = vadd.f32 %v781_v60, %v2688_v32  ;;  %vm1136_vm14 = vweird.f32 %v2704_v42  ;;  %v1092_v27 = vmul.f32 %v2702_v36, %v1091_v22  ;;  %v1759_v48 = vsel %vm1339_vm8, 1.0, %v3250_v28 }
  0xf1   :  { %v1767_v51 = vsel %vm1403_vm9, 1.0, %v3250_v28  ;;  %v2772_v55 = vadd.f32 %v693_v40, %v2688_v32  ;;  %vm2775_vm15 = vcmp.eq.f32.partialorder %v1126_v1, 8.507059e+37  ;;  %v1775_v63 = vsel %vm1467_vm13, 1.0, %v3250_v28  ;;  %v2786_v40 = vpop.f32.mrf.mxu1  ;;  %v2791_v28 = vpop.permute.xlu0 %192 }
  0xf2   :  { %v1801_v26 = vpop.eup %1800  ;;  %v1105_v22 = vsub.f32 1.0, %v1104_v25  ;;  %vm1108_vm0 = vweird.f32 %v2653_v12  ;;  %vm2782_vm1 = vcmp.eq.f32.partialorder %v1140_v3, 8.507059e+37  ;;  %3282 = vst [vmem:[#allocation14_spill] sm:$0xff] %v2786_v40  ;;  %v1093_v32 = vadd.f32 %v2702_v36, %v1092_v27  ;;  %v2793_v25 = vpop.permute.xlu1 %197 }
  0xf3   :  { %3277 = vst [vmem:[#allocation13_spill] sm:$0xff] %v2772_v55  ;;  %v1803_v56 = vpop.eup %1802  ;;  %v1118_v57 = vmul.f32 %v1801_v26, %v2691_v33  ;;  %vm1109_vm2 = vweird.f32 %v2727_v50  ;;  %v1114_v1 = vand.u32 2147483648, %v2653_v12  ;;  %vm1123_vm3 = vweird.f32 %v1801_v26 }
  0xf4   :  { %v1132_v18 = vmul.f32 %v1803_v56, %v2704_v42  ;;  %v1112_v3 = vand.u32 2147483647, %v2653_v12  ;;  %v3283_v8 = vrot.slane %v2647_v6, 1  ;;  %vm1137_vm6 = vweird.f32 %v1803_v56  ;;  %vm2825_vm7 = vmor %vm1108_vm0, %vm1109_vm2 }
  0xf5   :  { %v1119_v41 = vsub.f32 1.0, %v1118_v57  ;;  %v1097_v5 = vsel %vm1096_vm4, %v2702_v36, %v1093_v32  ;;  %v1106_v40 = vmul.f32 %v2727_v50, %v1105_v22  ;;  %v1115_v10 = vor.u32 1.1754944e-38, %v1114_v1  ;;  %vm1124_vm8 = vmor %vm1122_vm11, %vm1123_vm3 }
  0xf6   :  { %vm1235_vm5 = vcmp.lt.s32.totalorder %v2647_v6, %v3283_v8  ;;  %v1133_v27 = vsub.f32 1.0, %v1132_v18  ;;  %v740_v43 = vpop.f32.mrf.mxu2  ;;  %v655_v59 = vpop.f32.mrf.mxu0  ;;  %v1102_v7 = vsel %vm2756_vm12, %v1101_v19, %v1097_v5  ;;  %v3284_v53 = vmov %v3283_v8  ;;  %vm1138_vm10 = vmor %vm1136_vm14, %vm1137_vm6 }
  0xf7   :  { %v784_v57 = vpop.f32.mrf.mxu3  ;;  %v1120_v61 = vmul.f32 %v1801_v26, %v1119_v41  ;;  %v2810_v54 = vsel %vm1235_vm5, %v2647_v6, %v3284_v53  ;;  %v741_v18 = vadd.f32 %v740_v43, %v2791_v28  ;;  %v2813_v55 = vmul.f32 %v1751_v0, %v1102_v7  ;;  %v2904_v6 = vpop.permute.xlu2 %202 }
  0xf8   :  { %v1134_v8 = vmul.f32 %v1803_v56, %v1133_v27  ;;  %v2815_v16 = vmul.f32 %v1759_v48, %v1102_v7  ;;  %v785_v41 = vadd.f32 %v784_v57, %v2791_v28  ;;  %v656_v36 = vadd.f32 %v655_v59, %v2793_v25 }
  0xf9   :  { %v1121_v32 = vadd.f32 %v1801_v26, %v1120_v61  ;;  %v2819_v23 = vmul.f32 %v1767_v51, %v1102_v7  ;;  %v1323_v53 = vmul.f32 %v2813_v55, %v2602_v20  ;;  %v1107_v61 = vadd.f32 %v2727_v50, %v1106_v40 }
  0xfa   :  { %v1135_v43 = vadd.f32 %v1803_v56, %v1134_v8  ;;  %v1371_v59 = vmul.f32 %v2815_v16, %v2642_v62  ;;  %vm2837_vm9 = vcmp.eq.f32.partialorder %v1112_v3, 8.507059e+37  ;;  %v2846_v0 = vmul.f32 %v1775_v63, %v1102_v7 }
  0xfb   :  { %v1125_v12 = vsel %vm1124_vm8, %v1801_v26, %v1121_v32  ;;  %v1435_v33 = vmul.f32 %v2819_v23, %v2724_v49  ;;  %vm1292_vm11 = vcmp.eq.s32.totalorder %v2810_v54, 0  ;;  %v1111_v26 = vsel %vm2825_vm7, %v2727_v50, %v1107_v61 }
  0xfc   :  { %v1130_v20 = vsel %vm2775_vm15, %v2741_v2, %v1125_v12  ;;  %v1139_v62 = vsel %vm1138_vm10, %v1803_v56, %v1135_v43  ;;  %v1387_v19 = vadd.f32 %v1371_v59, %v1323_v53  ;;  %v1499_v1 = vmul.f32 %v2846_v0, %v656_v36 }
  0xfd   :  { %v1317_v42 = vmul.f32 %v2681_v29, %v1130_v20  ;;  %v2859_v49 = vsel %vm2782_vm1, %v2747_v13, %v1139_v62  ;;  %v1365_v48 = vmul.f32 %v2694_v34, %v1130_v20  ;;  %v1429_v51 = vmul.f32 %v2714_v46, %v1130_v20  ;;  %v699_v29 = vpop.f32.mrf.mxu1 }
  0xfe   :  { %v1318_v2 = vmul.f32 %v2686_v31, %v2859_v49  ;;  %v1366_v56 = vmul.f32 %v2709_v44, %v2859_v49  ;;  %v1430_v50 = vmul.f32 %v2719_v47, %v2859_v49  ;;  %v1451_v60 = vadd.f32 %v1435_v33, %v1387_v19  ;;  %v658_v43 = vpop.f32.mrf.mxu0  ;;  %v3290_v33 = vld [vmem:[#allocation10_spill] sm:$0xff]  ;;  %v3291_v19 = vld [vmem:[#allocation13_spill] sm:$0xff] }
  0xff   :  { %v1325_v63 = vmul.f32 %v1317_v42, %v2617_v37  ;;  %v1333_v13 = vmul.f32 %v1317_v42, %v2630_v45  ;;  %v1373_v22 = vmul.f32 %v1365_v48, %v2668_v21  ;;  %v1381_v34 = vmul.f32 %v1365_v48, %v2697_v35  ;;  %v743_v35 = vpop.f32.mrf.mxu2  ;;  %v787_v7 = vpop.f32.mrf.mxu3 }
 0x100   :  { %v1326_v46 = vmul.f32 %v1318_v2, %v2620_v38  ;;  %v1334_v31 = vmul.f32 %v1318_v2, %v2633_v52  ;;  %v1374_v9 = vmul.f32 %v1366_v56, %v2673_v24  ;;  %v1382_v44 = vmul.f32 %v1366_v56, %v2700_v39  ;;  %v3293_v2 = vld [vmem:[#allocation7_spill] sm:$0xff] }
 0x101   :  { %v1389_v40 = vadd.f32 %v1373_v22, %v1325_v63  ;;  %v2877_v47 = vadd.f32 %v1381_v34, %v1333_v13  ;;  %v700_v37 = vadd.f32 %v699_v29, %v2793_v25  ;;  %v1437_v21 = vmul.f32 %v1429_v51, %v2750_v17 }
 0x102   :  { %v1390_v45 = vadd.f32 %v1374_v9, %v1326_v46  ;;  %v2881_v3 = vadd.f32 %v1382_v44, %v1334_v31  ;;  %v1438_v38 = vmul.f32 %v1430_v50, %v2753_v15  ;;  %v1445_v52 = vmul.f32 %v1429_v51, %v741_v18  ;;  %v3295_v31 = vld [vmem:[#allocation4_spill] sm:$0xff] }
 0x103   :  { %v1515_v27 = vadd.f32 %v1499_v1, %v1451_v60  ;;  %v1116_v24 = vsel %vm2837_vm9, %v1115_v10, %v1111_v26  ;;  %v3289_v39 = vmov 0.0   ;;  %v1453_v8 = vadd.f32 %v1437_v21, %v1389_v40 }
 0x104   :  { %v1752_v57 = vsel %vm1292_vm11, 1.0, %v3289_v39  ;;  %v1454_v32 = vadd.f32 %v1438_v38, %v1390_v45  ;;  %v2890_v36 = vmul.f32 %v1430_v50, %v785_v41  ;;  %vm1340_vm12 = vcmp.eq.s32.totalorder %v2810_v54, 1  ;;  %v3294_v50 = vld [vmem:[#allocation12_spill] sm:$0xff]  ;;  %v3296_v45 = vld [vmem:[#allocation9_spill] sm:$0xff] }
 0x105   :  { %v1316_v5 = vmul.f32 %v1752_v57, %v1116_v24  ;;  %1531 = vst [vmem:[%s3245_s3] sm:$0xff] %v1515_v27  ;;  %vm1404_vm13 = vcmp.eq.s32.totalorder %v2810_v54, 2  ;;  %vm1468_vm14 = vcmp.eq.s32.totalorder %v2810_v54, 3  ;;  %v744_v10 = vadd.f32 %v743_v35, %v2793_v25  ;;  %v702_v22 = vpop.f32.mrf.mxu1 }
 0x106   :  { %v1760_v15 = vsel %vm1340_vm12, 1.0, %v3289_v39  ;;  %v1768_v18 = vsel %vm1404_vm13, 1.0, %v3289_v39  ;;  %v1776_v41 = vsel %vm1468_vm14, 1.0, %v3289_v39  ;;  %vm1469_vm15 = vcmp.eq.s32.totalorder %v2651_v11, 3  ;;  %v3292_v11 = vld [vmem:[#allocation8_spill] sm:$0xff]  ;;  %v810_v27 = vpop.f32.mrf.mxu0 }
 0x107   :  { %v1324_v17 = vmul.f32 %v1316_v5, %v2612_v30  ;;  %v1364_v53 = vmul.f32 %v1760_v15, %v1116_v24  ;;  %v1428_v59 = vmul.f32 %v1768_v18, %v1116_v24  ;;  %v1492_v61 = vmul.f32 %v1776_v41, %v1116_v24  ;;  %v746_v44 = vpop.f32.mrf.mxu2  ;;  %v3298_v41 = vld [vmem:[#allocation2_spill] sm:$0xff] }
 0x108   :  { %v1777_v12 = vsel %vm1469_vm15, 1.0, %v3289_v39  ;;  %v788_v54 = vadd.f32 %v787_v7, %v2793_v25  ;;  %vm1470_vm0 = vcmp.eq.s32.totalorder %v2655_v14, 3  ;;  %v641_v30 = vadd.f32 %v2586_v58, %v2590_v4 }
 0x109   :  { %v1372_v62 = vmul.f32 %v1364_v53, %v3290_v33  ;;  %v1436_v26 = vmul.f32 %v1428_v59, %v3291_v19  ;;  %v1500_v42 = vmul.f32 %v1492_v61, %v700_v37  ;;  %v1493_v48 = vmul.f32 %v1777_v12, %v1130_v20 }
 0x10a   :  { %v1778_v51 = vsel %vm1470_vm0, 1.0, %v3289_v39  ;;  %v647_v56 = vadd.f32 %v3293_v2, %v3292_v11  ;;  %v653_v60 = vadd.f32 %v3294_v50, %v2791_v28  ;;  %v659_v29 = vadd.f32 %v658_v43, %v2904_v6 }
 0x10b   :  { %v1388_v14 = vadd.f32 %v1372_v62, %v1324_v17  ;;  %v1501_v63 = vmul.f32 %v1493_v48, %v744_v10  ;;  %v1494_v58 = vmul.f32 %v1778_v51, %v2859_v49  ;;  %v1331_v13 = vmul.f32 %v2813_v55, %v641_v30  ;;  %v790_v49 = vpop.f32.mrf.mxu3  ;;  %v3297_v55 = vld [vmem:[#allocation14_spill] sm:$0xff] }
 0x10c   :  { %v1379_v34 = vmul.f32 %v2815_v16, %v647_v56  ;;  %v1443_v20 = vmul.f32 %v2819_v23, %v653_v60  ;;  %v1507_v46 = vmul.f32 %v2846_v0, %v659_v29  ;;  %v685_v9 = vadd.f32 %v3295_v31, %v2590_v4 }
 0x10d   :  { %v1452_v40 = vadd.f32 %v1436_v26, %v1388_v14  ;;  %v1517_v1 = vadd.f32 %v1501_v63, %v1453_v8  ;;  %v1502_v37 = vmul.f32 %v1494_v58, %v788_v54  ;;  %v691_v21 = vadd.f32 %v3296_v45, %v3292_v11  ;;  %v3299_v63 = vld [vmem:[#allocation3_spill] sm:$0xff] }
 0x10e   :  { %v1395_v38 = vadd.f32 %v1379_v34, %v1331_v13  ;;  %v697_v35 = vadd.f32 %v3297_v55, %v2791_v28  ;;  %v703_v16 = vadd.f32 %v702_v22, %v2904_v6  ;;  %v1332_v23 = vmul.f32 %v1316_v5, %v685_v9 }
 0x10f   :  { %v1516_v0 = vadd.f32 %v1500_v42, %v1452_v40  ;;  %1533 = vst [vmem:[%s3245_s3 + $0x10] sm:$0xff] %v1517_v1  ;;  %v1518_v24 = vadd.f32 %v1502_v37, %v1454_v32  ;;  %v1380_v57 = vmul.f32 %v1364_v53, %v691_v21  ;;  %v747_v7 = vadd.f32 %v746_v44, %v2904_v6  ;;  %v898_v51 = vpop.f32.mrf.mxu2  ;;  %v2962_v21 = vpop.f32.mrf.mxu0 }
 0x110   :  { %v1461_v8 = vadd.f32 %v1445_v52, %v2877_v47  ;;  %v1459_v43 = vadd.f32 %v1443_v20, %v1395_v38  ;;  %v1444_v10 = vmul.f32 %v1428_v59, %v697_v35  ;;  %v791_v17 = vadd.f32 %v790_v49, %v2904_v6 }
 0x111   :  { %1532 = vst [vmem:[%s3245_s3 + $0x8] sm:$0xff] %v1516_v0  ;;  %v1396_v5 = vadd.f32 %v1380_v57, %v1332_v23  ;;  %v1508_v15 = vmul.f32 %v1492_v61, %v703_v16  ;;  %v1509_v18 = vmul.f32 %v1493_v48, %v747_v7  ;;  %v811_v12 = vadd.f32 %v810_v27, %v3298_v41 }
 0x112   :  { %v1462_v32 = vadd.f32 %v2890_v36, %v2881_v3  ;;  %1534 = vst [vmem:[%s3245_s3 + $0x18] sm:$0xff] %v1518_v24  ;;  %v1523_v47 = vadd.f32 %v1507_v46, %v1459_v43  ;;  %v1510_v52 = vmul.f32 %v1494_v58, %v791_v17  ;;  %v854_v36 = vpop.f32.mrf.mxu1  ;;  %v899_v50 = vadd.f32 %v898_v51, %v3298_v41 }
 0x113   :  { %v1460_v53 = vadd.f32 %v1444_v10, %v1396_v5  ;;  %v1525_v59 = vadd.f32 %v1509_v18, %v1461_v8  ;;  %v993_v54 = vrot.slane %v811_v12, 4  ;;  %v855_v62 = vadd.f32 %v854_v36, %v3298_v41  ;;  %v942_v46 = vpop.f32.mrf.mxu3 }
 0x114   :  { %1539 = vst [vmem:[%s3245_s3 + $0x40] sm:$0xff] %v1523_v47  ;;  %v1526_v61 = vadd.f32 %v1510_v52, %v1462_v32  ;;  %v1005_v14 = vrot.slane %v899_v50, 4  ;;  %v943_v40 = vadd.f32 %v942_v46, %v3298_v41 }
 0x115   :  { %v1524_v30 = vadd.f32 %v1508_v15, %v1460_v53  ;;  %1541 = vst [vmem:[%s3245_s3 + $0x50] sm:$0xff] %v1525_v59  ;;  %v994_v3 = vmax.f32 %v811_v12, %v993_v54  ;;  %v999_v26 = vrot.slane %v855_v62, 4 }
 0x116   :  { %1542 = vst [vmem:[%s3245_s3 + $0x58] sm:$0xff] %v1526_v61  ;;  %v1006_v20 = vmax.f32 %v899_v50, %v1005_v14  ;;  %v1011_v55 = vrot.slane %v943_v40, 4 }
 0x117   :  { %1540 = vst [vmem:[%s3245_s3 + $0x48] sm:$0xff] %v1524_v30  ;;  %v995_v33 = vrot.slane %v994_v3, 2  ;;  %v1000_v48 = vmax.f32 %v855_v62, %v999_v26  ;;  %v901_v5 = vpop.f32.mrf.mxu2  ;;  %v816_v53 = vpop.f32.mrf.mxu0 }
 0x118   :  { %v1007_v9 = vrot.slane %v1006_v20, 2  ;;  %v1012_v27 = vmax.f32 %v943_v40, %v1011_v55 }
 0x119   :  { %v996_v19 = vmax.f32 %v994_v3, %v995_v33  ;;  %v1001_v56 = vrot.slane %v1000_v48, 2 }
 0x11a   :  { %v1008_v45 = vmax.f32 %v1006_v20, %v1007_v9  ;;  %v2964_v49 = vpop.f32.mrf.mxu1  ;;  %v1013_v8 = vrot.slane %v1012_v27, 2 }
 0x11b   :  { %v997_v42 = vrot.slane %v996_v19, 1  ;;  %v1002_v29 = vmax.f32 %v1000_v48, %v1001_v56  ;;  %v2967_v15 = vpop.f32.mrf.mxu3 }
 0x11c   :  { %v1009_v23 = vrot.slane %v1008_v45, 1 }
 0x11d   :  { %v998_v2 = vmax.f32 %v996_v19, %v997_v42  ;;  %v1003_v34 = vrot.slane %v1002_v29, 1 }
 0x11e   :  { %v1010_v24 = vmax.f32 %v1008_v45, %v1009_v23 }
 0x11f   :  { %v1021_v60 = vsub.f32 %v811_v12, %v998_v2  ;;  %vm1207_vm1 = vcmp.eq.f32.partialorder %v811_v12, %v998_v2  ;;  %v1004_v31 = vmax.f32 %v1002_v29, %v1003_v34  ;;  %v1014_v12 = vmax.f32 %v1012_v27, %v1013_v8 }
 0x120   :  { %v1215_v58 = vsel %vm1207_vm1, %v3299_v63, 8  ;;  %v1023_v10 = vsub.f32 %v899_v50, %v1010_v24  ;;  %vm1209_vm6 = vcmp.eq.f32.partialorder %v899_v50, %v1010_v24  ;;  %v904_v50 = vpop.f32.mrf.mxu2 }
 0x121   :  { %v1033_v13 = vmul.f32 1.442695, %v1021_v60  ;;  %v1255_v22 = vrot.slane %v1215_v58, 4  ;;  %v1022_v37 = vsub.f32 %v855_v62, %v1004_v31  ;;  %vm1208_vm3 = vcmp.eq.f32.partialorder %v855_v62, %v1004_v31  ;;  %v2979_v31 = vpop.f32.mrf.mxu0 }
 0x122   :  { %v1216_v38 = vsel %vm1208_vm3, %v3299_v63, 8  ;;  %v1217_v41 = vsel %vm1209_vm6, %v3299_v63, 8  ;;  %v1037_v32 = vmul.f32 1.442695, %v1023_v10  ;;  %v2970_v59 = vpop.f32.mrf.mxu1  ;;  %v1015_v61 = vrot.slane %v1014_v12, 1 }
 0x123   :  { %1804 = vpow2.f32 %v1033_v13  ;;  %vm1256_vm2 = vcmp.lt.s32.totalorder %v1215_v58, %v1255_v22  ;;  %v1035_v35 = vmul.f32 1.442695, %v1022_v37  ;;  %v1264_v16 = vrot.slane %v1216_v38, 4  ;;  %v948_v60 = vpop.f32.mrf.mxu3 }
 0x124   :  { %v1257_v44 = vsel %vm1256_vm2, %v1215_v58, %v1255_v22  ;;  %v1273_v47 = vrot.slane %v1217_v41, 4  ;;  %v1016_v26 = vmax.f32 %v1014_v12, %v1015_v61 }
 0x125   :  { %v1258_v1 = vrot.slane %v1257_v44, 2  ;;  %1806 = vpow2.f32 %v1035_v35  ;;  %vm1265_vm5 = vcmp.lt.s32.totalorder %v1216_v38, %v1264_v16 }
 0x126   :  { %v1266_v7 = vsel %vm1265_vm5, %v1216_v38, %v1264_v16  ;;  %1808 = vpow2.f32 %v1037_v32  ;;  %vm1274_vm8 = vcmp.lt.s32.totalorder %v1217_v41, %v1273_v47  ;;  %v1024_v2 = vsub.f32 %v943_v40, %v1016_v26 }
 0x127   :  { %vm1259_vm4 = vcmp.lt.s32.totalorder %v1257_v44, %v1258_v1  ;;  %v1267_v43 = vrot.slane %v1266_v7, 2  ;;  %v1275_v19 = vsel %vm1274_vm8, %v1217_v41, %v1273_v47  ;;  %vm1210_vm11 = vcmp.eq.f32.partialorder %v943_v40, %v1016_v26 }
 0x128   :  { %v1260_v17 = vsel %vm1259_vm4, %v1257_v44, %v1258_v1  ;;  %v1276_v42 = vrot.slane %v1275_v19, 2  ;;  %v1218_v56 = vsel %vm1210_vm11, %v3299_v63, 8  ;;  %v1039_v58 = vmul.f32 1.442695, %v1024_v2  ;;  %v3300_v1 = vld [vmem:[#allocation5_spill] sm:$0xff]  ;;  %v3009_v8 = vpop.f32.mrf.mxu2 }
 0x129   :  { %v1805_v0 = vpop.eup %1804  ;;  %vm1268_vm7 = vcmp.lt.s32.totalorder %v1266_v7, %v1267_v43  ;;  %v1261_v52 = vrot.slane %v1260_v17, 1  ;;  %v1282_v13 = vrot.slane %v1218_v56, 4  ;;  %v2986_v37 = vadd.f32 %v2962_v21, %v3300_v1 }
 0x12a   :  { %v1065_v57 = vrot.slane %v1805_v0, 4  ;;  %v1269_v30 = vsel %vm1268_vm7, %v1266_v7, %v1267_v43  ;;  %vm1277_vm12 = vcmp.lt.s32.totalorder %v1275_v19, %v1276_v42  ;;  %v2981_v9 = vpop.f32.mrf.mxu1  ;;  %v2990_v45 = vadd.f32 %v2964_v49, %v3300_v1 }
 0x12b   :  { %v1807_v3 = vpop.eup %1806  ;;  %v1270_v36 = vrot.slane %v1269_v30, 1  ;;  %vm1262_vm9 = vcmp.lt.s32.totalorder %v1260_v17, %v1261_v52  ;;  %v1278_v46 = vsel %vm1277_vm12, %v1275_v19, %v1276_v42  ;;  %vm1283_vm13 = vcmp.lt.s32.totalorder %v1218_v56, %v1282_v13  ;;  %v3011_v43 = vpop.f32.mrf.mxu3 }
 0x12c   :  { %v1066_v18 = vadd.f32 %v1805_v0, %v1065_v57  ;;  %v1071_v62 = vrot.slane %v1807_v3, 4  ;;  %v1809_v22 = vpop.eup %1808  ;;  %v2975_v34 = vsel %vm1262_vm9, %v1260_v17, %v1261_v52  ;;  %v1284_v40 = vsel %vm1283_vm13, %v1218_v56, %v1282_v13  ;;  %v3031_v52 = vpop.f32.mrf.mxu0  ;;  %v3307_v13 = vld [vmem:[#allocation6_spill] sm:$0xff] }
 0x12d   :  { %vm1271_vm10 = vcmp.lt.s32.totalorder %v1269_v30, %v1270_v36  ;;  %v1077_v44 = vrot.slane %v1809_v22, 4  ;;  %v1285_v35 = vrot.slane %v1284_v40, 2  ;;  %vm1295_vm14 = vcmp.eq.s32.totalorder %v2975_v34, 0 }
 0x12e   :  { %v1067_v54 = vrot.slane %v1066_v18, 2  ;;  %v1072_v51 = vadd.f32 %v1807_v3, %v1071_v62  ;;  %v2977_v20 = vsel %vm1271_vm10, %v1269_v30, %v1270_v36  ;;  %v2996_v23 = vadd.f32 %v901_v5, %v3300_v1 }
 0x12f   :  { %v1078_v55 = vadd.f32 %v1809_v22, %v1077_v44  ;;  %vm1296_vm15 = vcmp.eq.s32.totalorder %v2977_v20, 0  ;;  %v1279_v27 = vrot.slane %v1278_v46, 1  ;;  %vm1286_vm0 = vcmp.lt.s32.totalorder %v1284_v40, %v1285_v35 }
 0x130   :  { %v1068_v33 = vadd.f32 %v1067_v54, %v1066_v18  ;;  %v1073_v14 = vrot.slane %v1072_v51, 2  ;;  %v1755_v24 = vsel %vm1295_vm14, 1.0, %v3289_v39  ;;  %v3004_v57 = vadd.f32 %v2967_v15, %v3300_v1 }
 0x131   :  { %v1079_v21 = vrot.slane %v1078_v55, 2  ;;  %vm1280_vm1 = vcmp.lt.s32.totalorder %v1278_v46, %v1279_v27  ;;  %v3007_v7 = vadd.f32 %v816_v53, %v2590_v4  ;;  %v1287_v5 = vsel %vm1286_vm0, %v1284_v40, %v1285_v35 }
 0x132   :  { %v1069_v48 = vrot.slane %v1068_v33, 1  ;;  %v1074_v63 = vadd.f32 %v1073_v14, %v1072_v51  ;;  %v3023_v12 = vsel %vm1296_vm15, 1.0, %v3289_v39  ;;  %v3025_v32 = vsel %vm1280_vm1, %v1278_v46, %v1279_v27  ;;  %v3033_v53 = vpop.f32.mrf.mxu1  ;;  %v3063_v46 = vpop.f32.mrf.mxu2 }
 0x133   :  { %v1080_v17 = vadd.f32 %v1079_v21, %v1078_v55  ;;  %v3029_v47 = vadd.f32 %v2970_v59, %v2590_v4  ;;  %vm1297_vm4 = vcmp.eq.s32.totalorder %v3025_v32, 0  ;;  %v1288_v62 = vrot.slane %v1287_v5, 1 }
 0x134   :  { %v2973_v29 = vadd.f32 %v1069_v48, %v1068_v33  ;;  %v1075_v38 = vrot.slane %v1074_v63, 1  ;;  %v3041_v59 = vadd.f32 %v904_v50, %v2590_v4  ;;  %v3044_v42 = vadd.f32 %v948_v60, %v2590_v4  ;;  %v825_v35 = vpop.f32.mrf.mxu0 }
 0x135   :  { %v1081_v54 = vrot.slane %v1080_v17, 1  ;;  %vm3047_vm7 = vcmp.lt.s32.totalorder %v1287_v5, %v1288_v62  ;;  %v820_v22 = vadd.f32 %v2979_v31, %v3307_v13  ;;  %vm1343_vm9 = vcmp.eq.s32.totalorder %v2975_v34, 1 }
 0x136   :  { %1810 = vrcp.f32 %v2973_v29  ;;  %v1154_v16 = vand.u32 2147483647, %v2973_v29  ;;  %v2998_v0 = vadd.f32 %v1075_v38, %v1074_v63  ;;  %v1156_v49 = vand.u32 2147483648, %v2973_v29  ;;  %v3065_v63 = vpop.f32.mrf.mxu3 }
 0x137   :  { %1812 = vpow2.f32 %v1039_v58  ;;  %vm1150_vm2 = vweird.f32 %v2973_v29  ;;  %v3038_v19 = vadd.f32 %v1081_v54, %v1080_v17  ;;  %v3053_v58 = vsel %vm1297_vm4, 1.0, %v3289_v39 }
 0x138   :  { %1814 = vrcp.f32 %v2998_v0  ;;  %vm3016_vm3 = vcmp.eq.f32.partialorder %v1154_v16, 8.507059e+37  ;;  %v1157_v30 = vor.u32 1.1754944e-38, %v1156_v49  ;;  %v1170_v3 = vand.u32 2147483648, %v2998_v0 }
 0x139   :  { %v1168_v33 = vand.u32 2147483647, %v2998_v0  ;;  %vm1164_vm6 = vweird.f32 %v2998_v0  ;;  %1816 = vrcp.f32 %v3038_v19  ;;  %v1182_v40 = vand.u32 2147483647, %v3038_v19 }
 0x13a   :  { %v1171_v14 = vor.u32 1.1754944e-38, %v1170_v3  ;;  %v1184_v1 = vand.u32 2147483648, %v3038_v19  ;;  %v3074_v38 = vsel %vm3047_vm7, %v1287_v5, %v1288_v62  ;;  %vm1344_vm12 = vcmp.eq.s32.totalorder %v2977_v20, 1  ;;  %v3078_v16 = vpop.f32.mrf.mxu1 }
 0x13b   :  { %vm3056_vm8 = vcmp.eq.f32.partialorder %v1168_v33, 8.507059e+37  ;;  %vm1298_vm11 = vcmp.eq.s32.totalorder %v3074_v38, 0  ;;  %v1763_v21 = vsel %vm1343_vm9, 1.0, %v3289_v39  ;;  %v864_v49 = vadd.f32 %v2981_v9, %v3307_v13 }
 0x13c   :  { %v1811_v10 = vpop.eup %1810  ;;  %vm1178_vm14 = vweird.f32 %v3038_v19  ;;  %v1185_v15 = vor.u32 1.1754944e-38, %v1184_v1  ;;  %v3097_v54 = vsel %vm1298_vm11, 1.0, %v3289_v39  ;;  %v1764_v9 = vsel %vm1344_vm12, 1.0, %v3289_v39 }
 0x13d   :  { %v1813_v18 = vpop.eup %1812  ;;  %v1146_v41 = vmul.f32 %v1811_v10, %v2973_v29  ;;  %vm1151_vm5 = vweird.f32 %v1811_v10  ;;  %vm3103_vm15 = vcmp.eq.f32.partialorder %v1182_v40, 8.507059e+37  ;;  %v908_v3 = vadd.f32 %v3009_v8, %v3307_v13  ;;  %v913_v8 = vpop.f32.mrf.mxu2 }
 0x13e   :  { %v1083_v61 = vrot.slane %v1813_v18, 4  ;;  %v1815_v2 = vpop.eup %1814  ;;  %vm1152_vm10 = vmor %vm1150_vm2, %vm1151_vm5  ;;  %vm1345_vm0 = vcmp.eq.s32.totalorder %v3025_v32, 1  ;;  %v3118_v62 = vadd.f32 %v3011_v43, %v3307_v13  ;;  %vm1346_vm2 = vcmp.eq.s32.totalorder %v3074_v38, 1  ;;  %v828_v40 = vpop.f32.mrf.mxu0 }
 0x13f   :  { %v1147_v36 = vsub.f32 1.0, %v1146_v41  ;;  %v1160_v4 = vmul.f32 %v1815_v2, %v2998_v0  ;;  %vm1165_vm13 = vweird.f32 %v1815_v2  ;;  %v867_v60 = vadd.f32 %v3033_v53, %v3292_v11 }
 0x140   :  { %v1084_v26 = vadd.f32 %v1813_v18, %v1083_v61  ;;  %v1817_v18 = vpop.eup %1816  ;;  %vm1166_vm1 = vmor %vm1164_vm6, %vm1165_vm13  ;;  %vm1408_vm9 = vcmp.eq.s32.totalorder %v2977_v20, 2  ;;  %vm1410_vm12 = vcmp.eq.s32.totalorder %v3074_v38, 2  ;;  %vm1471_vm13 = vcmp.eq.s32.totalorder %v2975_v34, 3 }
 0x141   :  { %v1148_v48 = vmul.f32 %v1811_v10, %v1147_v36  ;;  %v1161_v55 = vsub.f32 1.0, %v1160_v4  ;;  %v1174_v61 = vmul.f32 %v1817_v18, %v3038_v19 }
 0x142   :  { %v1085_v56 = vrot.slane %v1084_v26, 2 }
 0x143   :  { %v1149_v50 = vadd.f32 %v1811_v10, %v1148_v48  ;;  %v1162_v17 = vmul.f32 %v1815_v2, %v1161_v55  ;;  %v1175_v48 = vsub.f32 1.0, %v1174_v61  ;;  %v1766_v55 = vsel %vm1346_vm2, 1.0, %v3289_v39 }
 0x144   :  { %v1086_v44 = vadd.f32 %v1085_v56, %v1084_v26  ;;  %v3121_v56 = vpop.f32.mrf.mxu3 }
 0x145   :  { %v1153_v31 = vsel %vm1152_vm10, %v1811_v10, %v1149_v50  ;;  %vm1409_vm10 = vcmp.eq.s32.totalorder %v3025_v32, 2 }
 0x146   :  { %v1087_v27 = vrot.slane %v1086_v44, 1  ;;  %v3082_v29 = vsel %vm3016_vm3, %v1157_v30, %v1153_v31  ;;  %vm1179_vm3 = vweird.f32 %v1817_v18 }
 0x147   :  { %v1319_v10 = vmul.f32 %v1755_v24, %v3082_v29  ;;  %v1367_v5 = vmul.f32 %v1763_v21, %v3082_v29  ;;  %v1163_v24 = vadd.f32 %v1815_v2, %v1162_v17  ;;  %vm1180_vm5 = vmor %vm1178_vm14, %vm1179_vm3  ;;  %vm1472_vm14 = vcmp.eq.s32.totalorder %v2977_v20, 3 }
 0x148   :  { %v3092_v41 = vadd.f32 %v1087_v27, %v1086_v44  ;;  %v1765_v44 = vsel %vm1345_vm0, 1.0, %v3289_v39  ;;  %vm1474_vm0 = vcmp.eq.s32.totalorder %v3074_v38, 3 }
 0x149   :  { %v1327_v36 = vmul.f32 %v1319_v10, %v2986_v37  ;;  %v1167_v26 = vsel %vm1166_vm1, %v1815_v2, %v1163_v24  ;;  %v1375_v51 = vmul.f32 %v1367_v5, %v820_v22  ;;  %v1335_v50 = vmul.f32 %v1319_v10, %v3007_v7  ;;  %v872_v7 = vpop.f32.mrf.mxu1  ;;  %v3312_v24 = vld [vmem:[#allocation11_spill] sm:$0xff] }
 0x14a   :  { %1818 = vrcp.f32 %v3092_v41  ;;  %v1198_v33 = vand.u32 2147483648, %v3092_v41  ;;  %v3125_v37 = vsel %vm3056_vm8, %v1171_v14, %v1167_v26  ;;  %v1196_v0 = vand.u32 2147483647, %v3092_v41 }
 0x14b   :  { %v1320_v43 = vmul.f32 %v3023_v12, %v3125_v37  ;;  %v1176_v2 = vmul.f32 %v1817_v18, %v1175_v48  ;;  %v1368_v13 = vmul.f32 %v1764_v9, %v3125_v37  ;;  %v1391_v22 = vadd.f32 %v1375_v51, %v1327_v36 }
 0x14c   :  { %v1199_v4 = vor.u32 1.1754944e-38, %v1198_v33  ;;  %v823_v14 = vadd.f32 %v3031_v52, %v3292_v11  ;;  %vm1192_vm4 = vweird.f32 %v3092_v41  ;;  %vm3151_vm6 = vcmp.eq.f32.partialorder %v1196_v0, 8.507059e+37  ;;  %v916_v33 = vpop.f32.mrf.mxu2 }
 0x14d   :  { %v1328_v1 = vmul.f32 %v1320_v43, %v2990_v45  ;;  %v1177_v12 = vadd.f32 %v1817_v18, %v1176_v2  ;;  %v1376_v31 = vmul.f32 %v1368_v13, %v864_v49  ;;  %v1336_v52 = vmul.f32 %v1320_v43, %v3029_v47 }
 0x14e   :  { %v1383_v53 = vmul.f32 %v1367_v5, %v823_v14  ;;  %v1384_v21 = vmul.f32 %v1368_v13, %v867_v60  ;;  %v911_v45 = vadd.f32 %v3063_v46, %v3292_v11  ;;  %v955_v9 = vadd.f32 %v3065_v63, %v3292_v11  ;;  %v960_v11 = vpop.f32.mrf.mxu3  ;;  %v831_v14 = vpop.f32.mrf.mxu0 }
 0x14f   :  { %v1181_v10 = vsel %vm1180_vm5, %v1817_v18, %v1177_v12  ;;  %v826_v19 = vadd.f32 %v825_v35, %v3312_v24  ;;  %v1392_v5 = vadd.f32 %v1376_v31, %v1328_v1  ;;  %vm1407_vm8 = vcmp.eq.s32.totalorder %v2975_v34, 2 }
 0x150   :  { %v1819_v27 = vpop.eup %1818  ;;  %v3160_v47 = vsel %vm3103_vm15, %v1185_v15, %v1181_v10  ;;  %v1771_v36 = vsel %vm1407_vm8, 1.0, %v3289_v39  ;;  %v1399_v63 = vadd.f32 %v1383_v53, %v1335_v50  ;;  %v1400_v35 = vadd.f32 %v1384_v21, %v1336_v52 }
 0x151   :  { %v1188_v17 = vmul.f32 %v1819_v27, %v3092_v41  ;;  %vm1193_vm7 = vweird.f32 %v1819_v27  ;;  %v1321_v46 = vmul.f32 %v3053_v58, %v3160_v47  ;;  %v1369_v61 = vmul.f32 %v1765_v44, %v3160_v47  ;;  %v875_v60 = vpop.f32.mrf.mxu1 }
 0x152   :  { %v1431_v30 = vmul.f32 %v1771_v36, %v3082_v29  ;;  %v870_v0 = vadd.f32 %v3078_v16, %v3312_v24  ;;  %v1772_v43 = vsel %vm1408_vm9, 1.0, %v3289_v39  ;;  %v1773_v44 = vsel %vm1409_vm10, 1.0, %v3289_v39  ;;  %vm1194_vm11 = vmor %vm1192_vm4, %vm1193_vm7 }
 0x153   :  { %v1189_v18 = vsub.f32 1.0, %v1188_v17  ;;  %v1329_v15 = vmul.f32 %v1321_v46, %v2996_v23  ;;  %v1337_v48 = vmul.f32 %v1321_v46, %v3041_v59  ;;  %v1377_v51 = vmul.f32 %v1369_v61, %v908_v3 }
 0x154   :  { %v1385_v58 = vmul.f32 %v1369_v61, %v911_v45  ;;  %v1439_v2 = vmul.f32 %v1431_v30, %v826_v19  ;;  %v1432_v13 = vmul.f32 %v1772_v43, %v3125_v37  ;;  %v914_v3 = vadd.f32 %v913_v8, %v3312_v24 }
 0x155   :  { %v1190_v26 = vmul.f32 %v1819_v27, %v1189_v18  ;;  %v1393_v23 = vadd.f32 %v1377_v51, %v1329_v15  ;;  %v1433_v16 = vmul.f32 %v1773_v44, %v3160_v47  ;;  %v958_v31 = vadd.f32 %v3121_v56, %v3312_v24 }
 0x156   :  { %v3180_v59 = vadd.f32 %v1385_v58, %v1337_v48  ;;  %v1455_v12 = vadd.f32 %v1439_v2, %v1391_v22  ;;  %v1774_v52 = vsel %vm1410_vm12, 1.0, %v3289_v39  ;;  %v829_v53 = vadd.f32 %v828_v40, %v2791_v28  ;;  %v919_v22 = vpop.f32.mrf.mxu2  ;;  %v963_v17 = vpop.f32.mrf.mxu3 }
 0x157   :  { %v1191_v50 = vadd.f32 %v1819_v27, %v1190_v26  ;;  %v873_v8 = vadd.f32 %v872_v7, %v2791_v28  ;;  %v1440_v10 = vmul.f32 %v1432_v13, %v870_v0  ;;  %v1441_v19 = vmul.f32 %v1433_v16, %v914_v3  ;;  %v834_v34 = vpop.f32.mrf.mxu0 }
 0x158   :  { %v1447_v56 = vmul.f32 %v1431_v30, %v829_v53  ;;  %v917_v46 = vadd.f32 %v916_v33, %v2791_v28  ;;  %v832_v30 = vadd.f32 %v831_v14, %v2793_v25  ;;  %v876_v33 = vadd.f32 %v875_v60, %v2793_v25 }
 0x159   :  { %v1195_v1 = vsel %vm1194_vm11, %v1819_v27, %v1191_v50  ;;  %v1448_v24 = vmul.f32 %v1432_v13, %v873_v8  ;;  %v1456_v7 = vadd.f32 %v1440_v10, %v1392_v5  ;;  %v1457_v61 = vadd.f32 %v1441_v19, %v1393_v23  ;;  %v878_v51 = vpop.f32.mrf.mxu1 }
 0x15a   :  { %v1200_v41 = vsel %vm3151_vm6, %v1199_v4, %v1195_v1  ;;  %v1449_v48 = vmul.f32 %v1433_v16, %v917_v46  ;;  %vm1473_vm15 = vcmp.eq.s32.totalorder %v3025_v32, 3  ;;  %v964_v0 = vadd.f32 %v963_v17, %v2793_v25 }
 0x15b   :  { %v1322_v21 = vmul.f32 %v3097_v54, %v1200_v41  ;;  %v1370_v45 = vmul.f32 %v1766_v55, %v1200_v41  ;;  %v1434_v27 = vmul.f32 %v1774_v52, %v1200_v41  ;;  %v1463_v55 = vadd.f32 %v1447_v56, %v1399_v63 }
 0x15c   :  { %v1464_v26 = vadd.f32 %v1448_v24, %v1400_v35  ;;  %v920_v35 = vadd.f32 %v919_v22, %v2793_v25  ;;  %v1781_v20 = vsel %vm1473_vm15, 1.0, %v3289_v39  ;;  %v835_v32 = vadd.f32 %v834_v34, %v2904_v6 }
 0x15d   :  { %v1330_v4 = vmul.f32 %v1322_v21, %v3004_v57  ;;  %v1338_v49 = vmul.f32 %v1322_v21, %v3044_v42  ;;  %v1378_v40 = vmul.f32 %v1370_v45, %v3118_v62  ;;  %v1386_v18 = vmul.f32 %v1370_v45, %v955_v9 }
 0x15e   :  { %v1442_v54 = vmul.f32 %v1434_v27, %v958_v31  ;;  %v961_v42 = vadd.f32 %v960_v11, %v2791_v28  ;;  %v1779_v62 = vsel %vm1471_vm13, 1.0, %v3289_v39  ;;  %v1780_v9 = vsel %vm1472_vm14, 1.0, %v3289_v39  ;;  %v922_v28 = vpop.f32.mrf.mxu2  ;;  %v966_v11 = vpop.f32.mrf.mxu3 }
 0x15f   :  { %v1394_v36 = vadd.f32 %v1378_v40, %v1330_v4  ;;  %v1402_v15 = vadd.f32 %v1386_v18, %v1338_v49  ;;  %v1495_v5 = vmul.f32 %v1779_v62, %v3082_v29  ;;  %v1496_v63 = vmul.f32 %v1780_v9, %v3125_v37 }
 0x160   :  { %v1450_v58 = vmul.f32 %v1434_v27, %v961_v42  ;;  %v1497_v29 = vmul.f32 %v1781_v20, %v3160_v47  ;;  %v1782_v37 = vsel %vm1474_vm0, 1.0, %v3289_v39  ;;  %v879_v13 = vadd.f32 %v878_v51, %v2904_v6 }
 0x161   :  { %v1458_v57 = vadd.f32 %v1442_v54, %v1394_v36  ;;  %v1503_v43 = vmul.f32 %v1495_v5, %v832_v30  ;;  %v1504_v50 = vmul.f32 %v1496_v63, %v876_v33  ;;  %v1498_v2 = vmul.f32 %v1782_v37, %v1200_v41 }
 0x162   :  { %v923_v44 = vadd.f32 %v922_v28, %v2904_v6  ;;  %v1505_v25 = vmul.f32 %v1497_v29, %v920_v35  ;;  %v967_v38 = vadd.f32 %v966_v11, %v2904_v6  ;;  %v1511_v14 = vmul.f32 %v1495_v5, %v835_v32 }
 0x163   :  { %v1519_v23 = vadd.f32 %v1503_v43, %v1455_v12  ;;  %v1520_v3 = vadd.f32 %v1504_v50, %v1456_v7  ;;  %v1506_v16 = vmul.f32 %v1498_v2, %v964_v0  ;;  %v1512_v60 = vmul.f32 %v1496_v63, %v879_v13 }
 0x164   :  { %v1513_v1 = vmul.f32 %v1497_v29, %v923_v44  ;;  %v1465_v47 = vadd.f32 %v1449_v48, %v3180_v59  ;;  %v1521_v39 = vadd.f32 %v1505_v25, %v1457_v61  ;;  %v1514_v31 = vmul.f32 %v1498_v2, %v967_v38 }
 0x165   :  { %1535 = vst [vmem:[%s3245_s3 + $0x20] sm:$0xff] %v1519_v23  ;;  %v1466_v41 = vadd.f32 %v1450_v58, %v1402_v15  ;;  %v1522_v12 = vadd.f32 %v1506_v16, %v1458_v57  ;;  %v1527_v52 = vadd.f32 %v1511_v14, %v1463_v55  ;;  %v1528_v6 = vadd.f32 %v1512_v60, %v1464_v26 }
 0x166   :  { %1536 = vst [vmem:[%s3245_s3 + $0x28] sm:$0xff] %v1520_v3  ;;  %v1529_v53 = vadd.f32 %v1513_v1, %v1465_v47 }
 0x167   :  { %1537 = vst [vmem:[%s3245_s3 + $0x30] sm:$0xff] %v1521_v39  ;;  %v1530_v59 = vadd.f32 %v1514_v31, %v1466_v41 }
 0x168   :  { %1538 = vst [vmem:[%s3245_s3 + $0x38] sm:$0xff] %v1522_v12 }
 0x169   :  { %1543 = vst [vmem:[%s3245_s3 + $0x60] sm:$0xff] %v1527_v52 }
 0x16a   :  { %1544 = vst [vmem:[%s3245_s3 + $0x68] sm:$0xff] %v1528_v6 }
 0x16b   :  { %1545 = vst [vmem:[%s3245_s3 + $0x70] sm:$0xff] %v1529_v53 }
 0x16c   :  { %1546 = vst [vmem:[%s3245_s3 + $0x78] sm:$0xff] %v1530_v59 }

</bundles_post_ra>
